<compile_context>
chip_gen: v7x
topology: tpu7x:2x2x1
jax: 0.10.0
libtpu: 0.0.40
codegen_flags: <defaults>
</compile_context>

<pallas_src>
import functools

import jax
import jax.numpy as jnp
from jax import lax
from jax.experimental import pallas as pl
from jax.experimental.pallas import tpu as pltpu

# ---- small BERT-like config (bert-base scaled down) ----
VOCAB, H, NH, HD, FF, LAYERS, MAXPOS, NTYPES = 100, 32, 4, 8, 64, 2, 16, 2
LN_EPS = 1e-12
VECW = 128                      # lane width of the packed bias/LN slab (and padded classifier)
N_VEC_ROWS = 4 + 8 * LAYERS     # rows in the packed vector slab


# ---------------- in-kernel helpers ----------------
def _layernorm(y, g, b):
    mu = jnp.mean(y, axis=-1, keepdims=True)
    var = jnp.mean(jnp.square(y - mu), axis=-1, keepdims=True)
    return (y - mu) * lax.rsqrt(var + LN_EPS) * g + b


def _gelu_tanh(y):
    # TODO(synk): HF BERT uses exact erf-GELU; tanh approximation used here.
    c = 0.7978845608028654  # sqrt(2/pi)
    return 0.5 * y * (1.0 + jnp.tanh(c * (y + 0.044715 * y * y * y)))


# ---------------- the fused kernel (whole forward, one batch chunk per program) ----------------
def _bert_fused_kernel(x_ref, mask_ref, vecs_ref, w_hin_ref, wo2_ref, w_head_ref, out_ref,
                       *, n_layers, n_heads, head_dim, ffn_dim, seq_len, chunk_b):
    hidden = n_heads * head_dim
    scale = 1.0 / float(head_dim) ** 0.5

    def vec(r, n=hidden):                       # packed bias/LN row -> (1, n) static slice
        return vecs_ref[r:r + 1, 0:n]

    # embedding LayerNorm over the stacked (chunk_B*S, H) slab
    x = _layernorm(x_ref[...], vec(0), vec(1))                      # (R, H)
    mask = mask_ref[...]                                            # (R, R) block-diag additive

    for l in range(n_layers):
        base = 4 + 8 * l
        w_l = w_hin_ref[l]                                          # (H, 3H | H | FF) packed
        wqkv_l = w_l[:, :3 * hidden]
        wo_l = w_l[:, 3 * hidden:4 * hidden]
        wi_l = w_l[:, 4 * hidden:4 * hidden + ffn_dim]

        # ---- self-attention: one fused QKV matmul over all stacked rows ----
        qkv = (jnp.dot(x, wqkv_l, preferred_element_type=jnp.float32)
               + vec(base + 0, 3 * hidden))                         # (R, 3H), per-head [q|k|v]
        ctx_parts = []
        for h in range(n_heads):
            blk = qkv[:, 3 * head_dim * h:3 * head_dim * (h + 1)]   # one contiguous 3*HD slice
            q_h = blk[:, :head_dim]
            k_h = blk[:, head_dim:2 * head_dim]
            v_h = blk[:, 2 * head_dim:]
            s = lax.dot_general(q_h, k_h, (((1,), (1,)), ((), ())),
                                preferred_element_type=jnp.float32) * scale + mask
            s = s - jnp.max(s, axis=-1, keepdims=True)
            p = jnp.exp(s)
            p = p * pl.reciprocal(jnp.sum(p, axis=-1, keepdims=True), approx=True)
            ctx_parts.append(jnp.dot(p, v_h, preferred_element_type=jnp.float32))   # (R, HD)
        ctx = jnp.concatenate(ctx_parts, axis=-1)                    # (R, H) lane concat
        attn_out = jnp.dot(ctx, wo_l, preferred_element_type=jnp.float32) + vec(base + 1)
        x = _layernorm(attn_out + x, vec(base + 2), vec(base + 3))   # residual + LN

        # ---- FFN ----
        inter = _gelu_tanh(jnp.dot(x, wi_l, preferred_element_type=jnp.float32)
                           + vec(base + 4, ffn_dim))
        ffn_out = jnp.dot(inter, wo2_ref[l], preferred_element_type=jnp.float32) + vec(base + 5)
        x = _layernorm(ffn_out + x, vec(base + 6), vec(base + 7))    # residual + LN

    # ---- pooler (tanh dense on each sequence's [CLS] row) + lane-padded classifier ----
    cls_rows = jnp.concatenate(
        [x[b * seq_len:b * seq_len + 1, :] for b in range(chunk_b)], axis=0)   # (chunk_B, H)
    pooled = jnp.tanh(jnp.dot(cls_rows, w_head_ref[:, 0:hidden],
                              preferred_element_type=jnp.float32) + vec(2))
    # classifier weight padded to 128 lanes -> lane-dense store; logit lives in lane 0
    out_ref[...] = (jnp.dot(pooled, w_head_ref[:, hidden:],
                            preferred_element_type=jnp.float32)
                    + vecs_ref[3:4, :])                              # (chunk_B, 128)


# ---------------- pallas_call wrapper ----------------
def _resident_spec(shape):
    # full-array block, same block every grid step -> weights stay resident in VMEM
    zeros = (0,) * len(shape)
    return pl.BlockSpec(shape, lambda c, _z=zeros: _z)


def bert_forward_fused(params, x_emb, attention_mask, *, num_chunks=1):
    # num_chunks=1: whole batch stacked along sublanes, single grid step (best on v5e/v6e).
    # On v7x use num_chunks=2 so each TensorCore gets one batch chunk.
    B, S, _ = x_emb.shape
    assert B % num_chunks == 0
    chunk_b = B // num_chunks
    rows = chunk_b * S

    x_slab = x_emb.reshape(num_chunks, rows, H)

    # block-diagonal additive attention mask per chunk: 0 where (same sequence AND key is
    # a real token), -1e9 otherwise. Built once in the wrapper, (num_chunks, rows, rows).
    key_ok = attention_mask.astype(jnp.float32).reshape(num_chunks, rows)
    seq_id = jnp.repeat(jnp.arange(chunk_b, dtype=jnp.int32), S)
    same_seq = (seq_id[:, None] == seq_id[None, :]).astype(jnp.float32)
    allowed = same_seq[None, :, :] * key_ok[:, None, :]
    mask_add = (1.0 - allowed) * jnp.float32(-1e9)

    kern = functools.partial(_bert_fused_kernel, n_layers=LAYERS, n_heads=NH, head_dim=HD,
                             ffn_dim=FF, seq_len=S, chunk_b=chunk_b)

    weights = (params["vecs"], params["w_hin"], params["wo2"], params["w_head"])
    in_specs = ([pl.BlockSpec((None, rows, H), lambda c: (c, 0, 0)),
                 pl.BlockSpec((None, rows, rows), lambda c: (c, 0, 0))]
                + [_resident_spec(w.shape) for w in weights])

    # advisory cost estimate so XLA schedules the embedding gathers around the custom call
    R = rows
    flops_layer = (2 * R * H * 3 * H          # QKV
                   + 2 * 2 * R * R * H        # scores + attn@V
                   + 2 * R * H * H            # Wo
                   + 2 * 2 * R * H * FF)      # FFN
    flops = num_chunks * (LAYERS * flops_layer + 2 * chunk_b * H * H + 2 * chunk_b * H * VECW)
    trans = num_chunks * (LAYERS * (NH * R * R + R * FF + NH * R) + chunk_b * H)
    bytes_accessed = 4 * (x_slab.size + mask_add.size + num_chunks * chunk_b * VECW
                          + sum(int(w.size) for w in weights))

    out = pl.pallas_call(
        kern,
        grid=(num_chunks,),
        in_specs=in_specs,
        out_specs=pl.BlockSpec((None, chunk_b, VECW), lambda c: (c, 0, 0)),
        out_shape=jax.ShapeDtypeStruct((num_chunks, chunk_b, VECW), jnp.float32),
        compiler_params=pltpu.CompilerParams(dimension_semantics=("parallel",)),
        cost_estimate=pl.CostEstimate(flops=int(flops), transcendentals=int(trans),
                                      bytes_accessed=int(bytes_accessed)),
    )(x_slab, mask_add, *weights)
    return out[:, :, 0].reshape(B, 1)


# ---------------- parameters (deterministic synthetic init, packed for the kernel) ----------------
def init_params(key):
    def nrm(k, shape):
        return 0.02 * jax.random.normal(k, shape, jnp.float32)

    keys = iter(jax.random.split(key, 5 + 6 * LAYERS))

    word_emb = nrm(next(keys), (VOCAB, H))
    pos_emb = nrm(next(keys), (MAXPOS, H))
    type_emb = nrm(next(keys), (NTYPES, H))
    pool_w = nrm(next(keys), (H, H))
    cls_w = nrm(next(keys), (H, 1))

    def head_interleave(wq, wk, wv):
        # (H, 3H) with per-head contiguous [q_h | k_h | v_h] column blocks
        return jnp.concatenate(
            [wq.reshape(H, NH, HD), wk.reshape(H, NH, HD), wv.reshape(H, NH, HD)],
            axis=2).reshape(H, 3 * H)

    def row(v):
        v = jnp.asarray(v, jnp.float32).reshape(-1)
        return jnp.zeros((VECW,), jnp.float32).at[:v.shape[0]].set(v)

    # packed bias/LN slab rows 0..3: emb_ln_g, emb_ln_b, pool_b, cls_b(lane 0)
    vec_rows = [row(jnp.ones(H)), row(jnp.zeros(H)), row(jnp.zeros(H)), row(jnp.zeros(1))]

    w_hin, wo2 = [], []
    for _ in range(LAYERS):
        wq = nrm(next(keys), (H, H))
        wk = nrm(next(keys), (H, H))
        wv = nrm(next(keys), (H, H))
        wo = nrm(next(keys), (H, H))
        wi = nrm(next(keys), (H, FF))
        w2 = nrm(next(keys), (FF, H))
        w_hin.append(jnp.concatenate([head_interleave(wq, wk, wv), wo, wi], axis=1))  # (H, 3H+H+FF)
        wo2.append(w2)
        bq, bk, bv = jnp.zeros(H), jnp.zeros(H), jnp.zeros(H)
        bqkv = jnp.concatenate([bq.reshape(NH, HD), bk.reshape(NH, HD), bv.reshape(NH, HD)],
                               axis=1).reshape(3 * H)                 # matches per-head W layout
        vec_rows += [row(bqkv),            # +0 bqkv
                     row(jnp.zeros(H)),    # +1 bo
                     row(jnp.ones(H)),     # +2 ln1_g
                     row(jnp.zeros(H)),    # +3 ln1_b
                     row(jnp.zeros(FF)),   # +4 bi
                     row(jnp.zeros(H)),    # +5 bo2
                     row(jnp.ones(H)),     # +6 ln2_g
                     row(jnp.zeros(H))]    # +7 ln2_b

    cls_pad = jnp.zeros((H, VECW), jnp.float32).at[:, 0].set(cls_w[:, 0])   # lane-padded classifier

    return {
        "word_emb": word_emb, "pos_emb": pos_emb, "type_emb": type_emb,
        "vecs": jnp.stack(vec_rows, axis=0),                   # (4 + 8*LAYERS, 128)
        "w_hin": jnp.stack(w_hin, axis=0),                     # (LAYERS, H, 3H+H+FF)
        "wo2": jnp.stack(wo2, axis=0),                         # (LAYERS, FF, H)
        "w_head": jnp.concatenate([pool_w, cls_pad], axis=1),  # (H, H+128)
    }


# ---------------- forward pass ----------------
def sentiment_model_forward(params, input_ids, attention_mask, *, num_chunks=1):
    B, S = input_ids.shape
    # embedding gathers in plain JAX (data-dependent gather); LN + the rest is in the kernel
    we = jnp.take(params["word_emb"], input_ids, axis=0)                 # (B, S, H)
    pe = jnp.broadcast_to(params["pos_emb"][:S][None], (B, S, H))        # (B, S, H)
    # TODO(synk): token_type_ids hard-wired to segment 0 (single-sentence sentiment usage).
    te = jnp.take(params["type_emb"], jnp.zeros_like(input_ids), axis=0)
    x_emb = (we + pe + te).astype(jnp.float32)                           # (B, S, H)
    return bert_forward_fused(params, x_emb, attention_mask, num_chunks=num_chunks)   # (B, 1)


if __name__ == "__main__":
    key = jax.random.PRNGKey(0)
    pkey, ikey = jax.random.split(key)
    params = init_params(pkey)

    B, S = 2, 8
    input_ids = jax.random.randint(ikey, (B, S), 0, VOCAB, dtype=jnp.int32)
    attention_mask = jnp.array([[1, 1, 1, 1, 1, 1, 1, 1],
                                [1, 1, 1, 1, 1, 1, 0, 0]], dtype=jnp.int32)

    fwd = jax.jit(sentiment_model_forward)
    out = fwd(params, input_ids, attention_mask)
    jax.block_until_ready(out)
    assert out.shape == (B, 1) and out.dtype == jnp.float32
    assert bool(jnp.all(jnp.isfinite(out)))
    print("KERNEL_OK")
</pallas_src>

<mosaic_0001>
module attributes {stable_mosaic.version = 11 : i64} {
  func.func @_bert_fused_kernel(%arg0: i32, %arg1: memref<1x16x32xf32, #tpu.memory_space<vmem>>, %arg2: memref<1x16x16xf32, #tpu.memory_space<vmem>>, %arg3: memref<20x128xf32, #tpu.memory_space<vmem>>, %arg4: memref<2x32x192xf32, #tpu.memory_space<vmem>>, %arg5: memref<2x64x32xf32, #tpu.memory_space<vmem>>, %arg6: memref<32x160xf32, #tpu.memory_space<vmem>>, %arg7: memref<1x2x128xf32, #tpu.memory_space<vmem>>) attributes {dimension_semantics = [#tpu.dimension_semantics<parallel>], iteration_bounds = array<i64: 1>, scalar_prefetch = 0 : i64, scratch_operands = 0 : i64, tpu.core_type = #tpu.core_type<tc>, window_params = [{transform_indices = @transform_0, window_bounds = array<i64: 1, 16, 32>}, {transform_indices = @transform_1, window_bounds = array<i64: 1, 16, 16>}, {pipeline_mode = #tpu.pipeline_mode<synchronous>, transform_indices = @transform_2, window_bounds = array<i64: 20, 128>}, {pipeline_mode = #tpu.pipeline_mode<synchronous>, transform_indices = @transform_3, window_bounds = array<i64: 2, 32, 192>}, {pipeline_mode = #tpu.pipeline_mode<synchronous>, transform_indices = @transform_4, window_bounds = array<i64: 2, 64, 32>}, {pipeline_mode = #tpu.pipeline_mode<synchronous>, transform_indices = @transform_5, window_bounds = array<i64: 32, 160>}, {transform_indices = @transform_6, window_bounds = array<i64: 1, 2, 128>}]} {
    %c0 = arith.constant 0 : index
    %c0_0 = arith.constant 0 : index
    %c0_1 = arith.constant 0 : index
    %0 = vector.load %arg1[%c0, %c0_0, %c0_1] : memref<1x16x32xf32, #tpu.memory_space<vmem>>, vector<1x16x32xf32>
    %1 = vector.shape_cast %0 : vector<1x16x32xf32> to vector<16x32xf32>
    %c0_2 = arith.constant 0 : index
    %c0_3 = arith.constant 0 : index
    %2 = vector.load %arg3[%c0_2, %c0_3] : memref<20x128xf32, #tpu.memory_space<vmem>>, vector<1x32xf32>
    %c1 = arith.constant 1 : index
    %c0_4 = arith.constant 0 : index
    %3 = vector.load %arg3[%c1, %c0_4] : memref<20x128xf32, #tpu.memory_space<vmem>>, vector<1x32xf32>
    %cst = arith.constant dense<0.000000e+00> : vector<16xf32>
    %4 = vector.multi_reduction <add>, %1, %cst [1] : vector<16x32xf32> to vector<16xf32>
    %5 = vector.shape_cast %4 : vector<16xf32> to vector<16x1xf32>
    %cst_5 = arith.constant 3.200000e+01 : f32
    %6 = vector.broadcast %cst_5 : f32 to vector<16x1xf32>
    %7 = arith.divf %5, %6 : vector<16x1xf32>
    %8 = vector.broadcast %7 : vector<16x1xf32> to vector<16x32xf32>
    %9 = arith.subf %1, %8 : vector<16x32xf32>
    %10 = arith.mulf %9, %9 : vector<16x32xf32>
    %cst_6 = arith.constant dense<0.000000e+00> : vector<16xf32>
    %11 = vector.multi_reduction <add>, %10, %cst_6 [1] : vector<16x32xf32> to vector<16xf32>
    %12 = vector.shape_cast %11 : vector<16xf32> to vector<16x1xf32>
    %cst_7 = arith.constant 3.200000e+01 : f32
    %13 = vector.broadcast %cst_7 : f32 to vector<16x1xf32>
    %14 = arith.divf %12, %13 : vector<16x1xf32>
    %15 = vector.broadcast %7 : vector<16x1xf32> to vector<16x32xf32>
    %16 = arith.subf %1, %15 : vector<16x32xf32>
    %cst_8 = arith.constant 9.99999996E-13 : f32
    %17 = vector.broadcast %cst_8 : f32 to vector<16x1xf32>
    %18 = arith.addf %14, %17 : vector<16x1xf32>
    %19 = math.rsqrt %18 : vector<16x1xf32>
    %20 = vector.broadcast %19 : vector<16x1xf32> to vector<16x32xf32>
    %21 = arith.mulf %16, %20 : vector<16x32xf32>
    %22 = vector.broadcast %2 : vector<1x32xf32> to vector<16x32xf32>
    %23 = arith.mulf %21, %22 : vector<16x32xf32>
    %24 = vector.broadcast %3 : vector<1x32xf32> to vector<16x32xf32>
    %25 = arith.addf %23, %24 : vector<16x32xf32>
    %c0_9 = arith.constant 0 : index
    %c0_10 = arith.constant 0 : index
    %c0_11 = arith.constant 0 : index
    %26 = vector.load %arg2[%c0_9, %c0_10, %c0_11] : memref<1x16x16xf32, #tpu.memory_space<vmem>>, vector<1x16x16xf32>
    %27 = vector.shape_cast %26 : vector<1x16x16xf32> to vector<16x16xf32>
    %c0_12 = arith.constant 0 : index
    %c0_13 = arith.constant 0 : index
    %c0_14 = arith.constant 0 : index
    %28 = vector.load %arg4[%c0_12, %c0_13, %c0_14] : memref<2x32x192xf32, #tpu.memory_space<vmem>>, vector<1x32x192xf32>
    %29 = vector.shape_cast %28 : vector<1x32x192xf32> to vector<32x192xf32>
    %30 = vector.extract_strided_slice %29 {offsets = [0, 0], sizes = [32, 96], strides = [1, 1]} : vector<32x192xf32> to vector<32x96xf32>
    %31 = vector.extract_strided_slice %29 {offsets = [0, 96], sizes = [32, 32], strides = [1, 1]} : vector<32x192xf32> to vector<32x32xf32>
    %32 = vector.extract_strided_slice %29 {offsets = [0, 128], sizes = [32, 64], strides = [1, 1]} : vector<32x192xf32> to vector<32x64xf32>
    %cst_15 = arith.constant dense<0.000000e+00> : vector<16x96xf32>
    %33 = tpu.matmul %25, %30, %cst_15 {dimension_numbers = #tpu.dot_dimension_numbers<[1], [0], [0], [1], [0, 0, 1, 1], [], []>} : vector<16x32xf32>, vector<32x96xf32>, vector<16x96xf32> -> vector<16x96xf32>
    %c4 = arith.constant 4 : index
    %c0_16 = arith.constant 0 : index
    %34 = vector.load %arg3[%c4, %c0_16] : memref<20x128xf32, #tpu.memory_space<vmem>>, vector<1x96xf32>
    %35 = vector.broadcast %34 : vector<1x96xf32> to vector<16x96xf32>
    %36 = arith.addf %33, %35 : vector<16x96xf32>
    %37 = vector.extract_strided_slice %36 {offsets = [0, 0], sizes = [16, 24], strides = [1, 1]} : vector<16x96xf32> to vector<16x24xf32>
    %38 = vector.extract_strided_slice %37 {offsets = [0, 0], sizes = [16, 8], strides = [1, 1]} : vector<16x24xf32> to vector<16x8xf32>
    %39 = vector.extract_strided_slice %37 {offsets = [0, 8], sizes = [16, 8], strides = [1, 1]} : vector<16x24xf32> to vector<16x8xf32>
    %40 = vector.extract_strided_slice %37 {offsets = [0, 16], sizes = [16, 8], strides = [1, 1]} : vector<16x24xf32> to vector<16x8xf32>
    %cst_17 = arith.constant dense<0.000000e+00> : vector<16x16xf32>
    %41 = tpu.matmul %38, %39, %cst_17 {dimension_numbers = #tpu.dot_dimension_numbers<[1], [1], [0], [0], [0, 0, 1, 0], [], []>} : vector<16x8xf32>, vector<16x8xf32>, vector<16x16xf32> -> vector<16x16xf32>
    %cst_18 = arith.constant 0.353553385 : f32
    %42 = vector.broadcast %cst_18 : f32 to vector<16x16xf32>
    %43 = arith.mulf %41, %42 : vector<16x16xf32>
    %44 = arith.addf %43, %27 : vector<16x16xf32>
    %cst_19 = arith.constant dense<0xFF800000> : vector<16xf32>
    %45 = vector.multi_reduction <maximumf>, %44, %cst_19 [1] : vector<16x16xf32> to vector<16xf32>
    %46 = vector.shape_cast %45 : vector<16xf32> to vector<16x1xf32>
    %47 = vector.broadcast %46 : vector<16x1xf32> to vector<16x16xf32>
    %48 = arith.subf %44, %47 : vector<16x16xf32>
    %49 = math.exp %48 : vector<16x16xf32>
    %cst_20 = arith.constant dense<0.000000e+00> : vector<16xf32>
    %50 = vector.multi_reduction <add>, %49, %cst_20 [1] : vector<16x16xf32> to vector<16xf32>
    %51 = vector.shape_cast %50 : vector<16xf32> to vector<16x1xf32>
    %52 = tpu.reciprocal %51 {approx = true} : vector<16x1xf32> -> vector<16x1xf32>
    %53 = vector.broadcast %52 : vector<16x1xf32> to vector<16x16xf32>
    %54 = arith.mulf %49, %53 : vector<16x16xf32>
    %cst_21 = arith.constant dense<0.000000e+00> : vector<16x8xf32>
    %55 = tpu.matmul %54, %40, %cst_21 {dimension_numbers = #tpu.dot_dimension_numbers<[1], [0], [0], [1], [0, 0, 1, 1], [], []>} : vector<16x16xf32>, vector<16x8xf32>, vector<16x8xf32> -> vector<16x8xf32>
    %56 = vector.extract_strided_slice %36 {offsets = [0, 24], sizes = [16, 24], strides = [1, 1]} : vector<16x96xf32> to vector<16x24xf32>
    %57 = vector.extract_strided_slice %56 {offsets = [0, 0], sizes = [16, 8], strides = [1, 1]} : vector<16x24xf32> to vector<16x8xf32>
    %58 = vector.extract_strided_slice %56 {offsets = [0, 8], sizes = [16, 8], strides = [1, 1]} : vector<16x24xf32> to vector<16x8xf32>
    %59 = vector.extract_strided_slice %56 {offsets = [0, 16], sizes = [16, 8], strides = [1, 1]} : vector<16x24xf32> to vector<16x8xf32>
    %cst_22 = arith.constant dense<0.000000e+00> : vector<16x16xf32>
    %60 = tpu.matmul %57, %58, %cst_22 {dimension_numbers = #tpu.dot_dimension_numbers<[1], [1], [0], [0], [0, 0, 1, 0], [], []>} : vector<16x8xf32>, vector<16x8xf32>, vector<16x16xf32> -> vector<16x16xf32>
    %cst_23 = arith.constant 0.353553385 : f32
    %61 = vector.broadcast %cst_23 : f32 to vector<16x16xf32>
    %62 = arith.mulf %60, %61 : vector<16x16xf32>
    %63 = arith.addf %62, %27 : vector<16x16xf32>
    %cst_24 = arith.constant dense<0xFF800000> : vector<16xf32>
    %64 = vector.multi_reduction <maximumf>, %63, %cst_24 [1] : vector<16x16xf32> to vector<16xf32>
    %65 = vector.shape_cast %64 : vector<16xf32> to vector<16x1xf32>
    %66 = vector.broadcast %65 : vector<16x1xf32> to vector<16x16xf32>
    %67 = arith.subf %63, %66 : vector<16x16xf32>
    %68 = math.exp %67 : vector<16x16xf32>
    %cst_25 = arith.constant dense<0.000000e+00> : vector<16xf32>
    %69 = vector.multi_reduction <add>, %68, %cst_25 [1] : vector<16x16xf32> to vector<16xf32>
    %70 = vector.shape_cast %69 : vector<16xf32> to vector<16x1xf32>
    %71 = tpu.reciprocal %70 {approx = true} : vector<16x1xf32> -> vector<16x1xf32>
    %72 = vector.broadcast %71 : vector<16x1xf32> to vector<16x16xf32>
    %73 = arith.mulf %68, %72 : vector<16x16xf32>
    %cst_26 = arith.constant dense<0.000000e+00> : vector<16x8xf32>
    %74 = tpu.matmul %73, %59, %cst_26 {dimension_numbers = #tpu.dot_dimension_numbers<[1], [0], [0], [1], [0, 0, 1, 1], [], []>} : vector<16x16xf32>, vector<16x8xf32>, vector<16x8xf32> -> vector<16x8xf32>
    %75 = vector.extract_strided_slice %36 {offsets = [0, 48], sizes = [16, 24], strides = [1, 1]} : vector<16x96xf32> to vector<16x24xf32>
    %76 = vector.extract_strided_slice %75 {offsets = [0, 0], sizes = [16, 8], strides = [1, 1]} : vector<16x24xf32> to vector<16x8xf32>
    %77 = vector.extract_strided_slice %75 {offsets = [0, 8], sizes = [16, 8], strides = [1, 1]} : vector<16x24xf32> to vector<16x8xf32>
    %78 = vector.extract_strided_slice %75 {offsets = [0, 16], sizes = [16, 8], strides = [1, 1]} : vector<16x24xf32> to vector<16x8xf32>
    %cst_27 = arith.constant dense<0.000000e+00> : vector<16x16xf32>
    %79 = tpu.matmul %76, %77, %cst_27 {dimension_numbers = #tpu.dot_dimension_numbers<[1], [1], [0], [0], [0, 0, 1, 0], [], []>} : vector<16x8xf32>, vector<16x8xf32>, vector<16x16xf32> -> vector<16x16xf32>
    %cst_28 = arith.constant 0.353553385 : f32
    %80 = vector.broadcast %cst_28 : f32 to vector<16x16xf32>
    %81 = arith.mulf %79, %80 : vector<16x16xf32>
    %82 = arith.addf %81, %27 : vector<16x16xf32>
    %cst_29 = arith.constant dense<0xFF800000> : vector<16xf32>
    %83 = vector.multi_reduction <maximumf>, %82, %cst_29 [1] : vector<16x16xf32> to vector<16xf32>
    %84 = vector.shape_cast %83 : vector<16xf32> to vector<16x1xf32>
    %85 = vector.broadcast %84 : vector<16x1xf32> to vector<16x16xf32>
    %86 = arith.subf %82, %85 : vector<16x16xf32>
    %87 = math.exp %86 : vector<16x16xf32>
    %cst_30 = arith.constant dense<0.000000e+00> : vector<16xf32>
    %88 = vector.multi_reduction <add>, %87, %cst_30 [1] : vector<16x16xf32> to vector<16xf32>
    %89 = vector.shape_cast %88 : vector<16xf32> to vector<16x1xf32>
    %90 = tpu.reciprocal %89 {approx = true} : vector<16x1xf32> -> vector<16x1xf32>
    %91 = vector.broadcast %90 : vector<16x1xf32> to vector<16x16xf32>
    %92 = arith.mulf %87, %91 : vector<16x16xf32>
    %cst_31 = arith.constant dense<0.000000e+00> : vector<16x8xf32>
    %93 = tpu.matmul %92, %78, %cst_31 {dimension_numbers = #tpu.dot_dimension_numbers<[1], [0], [0], [1], [0, 0, 1, 1], [], []>} : vector<16x16xf32>, vector<16x8xf32>, vector<16x8xf32> -> vector<16x8xf32>
    %94 = vector.extract_strided_slice %36 {offsets = [0, 72], sizes = [16, 24], strides = [1, 1]} : vector<16x96xf32> to vector<16x24xf32>
    %95 = vector.extract_strided_slice %94 {offsets = [0, 0], sizes = [16, 8], strides = [1, 1]} : vector<16x24xf32> to vector<16x8xf32>
    %96 = vector.extract_strided_slice %94 {offsets = [0, 8], sizes = [16, 8], strides = [1, 1]} : vector<16x24xf32> to vector<16x8xf32>
    %97 = vector.extract_strided_slice %94 {offsets = [0, 16], sizes = [16, 8], strides = [1, 1]} : vector<16x24xf32> to vector<16x8xf32>
    %cst_32 = arith.constant dense<0.000000e+00> : vector<16x16xf32>
    %98 = tpu.matmul %95, %96, %cst_32 {dimension_numbers = #tpu.dot_dimension_numbers<[1], [1], [0], [0], [0, 0, 1, 0], [], []>} : vector<16x8xf32>, vector<16x8xf32>, vector<16x16xf32> -> vector<16x16xf32>
    %cst_33 = arith.constant 0.353553385 : f32
    %99 = vector.broadcast %cst_33 : f32 to vector<16x16xf32>
    %100 = arith.mulf %98, %99 : vector<16x16xf32>
    %101 = arith.addf %100, %27 : vector<16x16xf32>
    %cst_34 = arith.constant dense<0xFF800000> : vector<16xf32>
    %102 = vector.multi_reduction <maximumf>, %101, %cst_34 [1] : vector<16x16xf32> to vector<16xf32>
    %103 = vector.shape_cast %102 : vector<16xf32> to vector<16x1xf32>
    %104 = vector.broadcast %103 : vector<16x1xf32> to vector<16x16xf32>
    %105 = arith.subf %101, %104 : vector<16x16xf32>
    %106 = math.exp %105 : vector<16x16xf32>
    %cst_35 = arith.constant dense<0.000000e+00> : vector<16xf32>
    %107 = vector.multi_reduction <add>, %106, %cst_35 [1] : vector<16x16xf32> to vector<16xf32>
    %108 = vector.shape_cast %107 : vector<16xf32> to vector<16x1xf32>
    %109 = tpu.reciprocal %108 {approx = true} : vector<16x1xf32> -> vector<16x1xf32>
    %110 = vector.broadcast %109 : vector<16x1xf32> to vector<16x16xf32>
    %111 = arith.mulf %106, %110 : vector<16x16xf32>
    %cst_36 = arith.constant dense<0.000000e+00> : vector<16x8xf32>
    %112 = tpu.matmul %111, %97, %cst_36 {dimension_numbers = #tpu.dot_dimension_numbers<[1], [0], [0], [1], [0, 0, 1, 1], [], []>} : vector<16x16xf32>, vector<16x8xf32>, vector<16x8xf32> -> vector<16x8xf32>
    %113 = tpu.concatenate %55, %74, %93, %112 in 1 : vector<16x8xf32>, vector<16x8xf32>, vector<16x8xf32>, vector<16x8xf32> -> vector<16x32xf32>
    %cst_37 = arith.constant dense<0.000000e+00> : vector<16x32xf32>
    %114 = tpu.matmul %113, %31, %cst_37 {dimension_numbers = #tpu.dot_dimension_numbers<[1], [0], [0], [1], [0, 0, 1, 1], [], []>} : vector<16x32xf32>, vector<32x32xf32>, vector<16x32xf32> -> vector<16x32xf32>
    %c5 = arith.constant 5 : index
    %c0_38 = arith.constant 0 : index
    %115 = vector.load %arg3[%c5, %c0_38] : memref<20x128xf32, #tpu.memory_space<vmem>>, vector<1x32xf32>
    %116 = vector.broadcast %115 : vector<1x32xf32> to vector<16x32xf32>
    %117 = arith.addf %114, %116 : vector<16x32xf32>
    %118 = arith.addf %117, %25 : vector<16x32xf32>
    %c6 = arith.constant 6 : index
    %c0_39 = arith.constant 0 : index
    %119 = vector.load %arg3[%c6, %c0_39] : memref<20x128xf32, #tpu.memory_space<vmem>>, vector<1x32xf32>
    %c7 = arith.constant 7 : index
    %c0_40 = arith.constant 0 : index
    %120 = vector.load %arg3[%c7, %c0_40] : memref<20x128xf32, #tpu.memory_space<vmem>>, vector<1x32xf32>
    %cst_41 = arith.constant dense<0.000000e+00> : vector<16xf32>
    %121 = vector.multi_reduction <add>, %118, %cst_41 [1] : vector<16x32xf32> to vector<16xf32>
    %122 = vector.shape_cast %121 : vector<16xf32> to vector<16x1xf32>
    %cst_42 = arith.constant 3.200000e+01 : f32
    %123 = vector.broadcast %cst_42 : f32 to vector<16x1xf32>
    %124 = arith.divf %122, %123 : vector<16x1xf32>
    %125 = vector.broadcast %124 : vector<16x1xf32> to vector<16x32xf32>
    %126 = arith.subf %118, %125 : vector<16x32xf32>
    %127 = arith.mulf %126, %126 : vector<16x32xf32>
    %cst_43 = arith.constant dense<0.000000e+00> : vector<16xf32>
    %128 = vector.multi_reduction <add>, %127, %cst_43 [1] : vector<16x32xf32> to vector<16xf32>
    %129 = vector.shape_cast %128 : vector<16xf32> to vector<16x1xf32>
    %cst_44 = arith.constant 3.200000e+01 : f32
    %130 = vector.broadcast %cst_44 : f32 to vector<16x1xf32>
    %131 = arith.divf %129, %130 : vector<16x1xf32>
    %132 = vector.broadcast %124 : vector<16x1xf32> to vector<16x32xf32>
    %133 = arith.subf %118, %132 : vector<16x32xf32>
    %cst_45 = arith.constant 9.99999996E-13 : f32
    %134 = vector.broadcast %cst_45 : f32 to vector<16x1xf32>
    %135 = arith.addf %131, %134 : vector<16x1xf32>
    %136 = math.rsqrt %135 : vector<16x1xf32>
    %137 = vector.broadcast %136 : vector<16x1xf32> to vector<16x32xf32>
    %138 = arith.mulf %133, %137 : vector<16x32xf32>
    %139 = vector.broadcast %119 : vector<1x32xf32> to vector<16x32xf32>
    %140 = arith.mulf %138, %139 : vector<16x32xf32>
    %141 = vector.broadcast %120 : vector<1x32xf32> to vector<16x32xf32>
    %142 = arith.addf %140, %141 : vector<16x32xf32>
    %cst_46 = arith.constant dense<0.000000e+00> : vector<16x64xf32>
    %143 = tpu.matmul %142, %32, %cst_46 {dimension_numbers = #tpu.dot_dimension_numbers<[1], [0], [0], [1], [0, 0, 1, 1], [], []>} : vector<16x32xf32>, vector<32x64xf32>, vector<16x64xf32> -> vector<16x64xf32>
    %c8 = arith.constant 8 : index
    %c0_47 = arith.constant 0 : index
    %144 = vector.load %arg3[%c8, %c0_47] : memref<20x128xf32, #tpu.memory_space<vmem>>, vector<1x64xf32>
    %145 = vector.broadcast %144 : vector<1x64xf32> to vector<16x64xf32>
    %146 = arith.addf %143, %145 : vector<16x64xf32>
    %cst_48 = arith.constant 5.000000e-01 : f32
    %147 = vector.broadcast %cst_48 : f32 to vector<16x64xf32>
    %148 = arith.mulf %147, %146 : vector<16x64xf32>
    %cst_49 = arith.constant 4.471500e-02 : f32
    %149 = vector.broadcast %cst_49 : f32 to vector<16x64xf32>
    %150 = arith.mulf %149, %146 : vector<16x64xf32>
    %151 = arith.mulf %150, %146 : vector<16x64xf32>
    %152 = arith.mulf %151, %146 : vector<16x64xf32>
    %153 = arith.addf %146, %152 : vector<16x64xf32>
    %cst_50 = arith.constant 0.797884583 : f32
    %154 = vector.broadcast %cst_50 : f32 to vector<16x64xf32>
    %155 = arith.mulf %154, %153 : vector<16x64xf32>
    %156 = math.tanh %155 : vector<16x64xf32>
    %cst_51 = arith.constant 1.000000e+00 : f32
    %157 = vector.broadcast %cst_51 : f32 to vector<16x64xf32>
    %158 = arith.addf %157, %156 : vector<16x64xf32>
    %159 = arith.mulf %148, %158 : vector<16x64xf32>
    %c0_52 = arith.constant 0 : index
    %c0_53 = arith.constant 0 : index
    %c0_54 = arith.constant 0 : index
    %160 = vector.load %arg5[%c0_52, %c0_53, %c0_54] : memref<2x64x32xf32, #tpu.memory_space<vmem>>, vector<1x64x32xf32>
    %161 = vector.shape_cast %160 : vector<1x64x32xf32> to vector<64x32xf32>
    %cst_55 = arith.constant dense<0.000000e+00> : vector<16x32xf32>
    %162 = tpu.matmul %159, %161, %cst_55 {dimension_numbers = #tpu.dot_dimension_numbers<[1], [0], [0], [1], [0, 0, 1, 1], [], []>} : vector<16x64xf32>, vector<64x32xf32>, vector<16x32xf32> -> vector<16x32xf32>
    %c9 = arith.constant 9 : index
    %c0_56 = arith.constant 0 : index
    %163 = vector.load %arg3[%c9, %c0_56] : memref<20x128xf32, #tpu.memory_space<vmem>>, vector<1x32xf32>
    %164 = vector.broadcast %163 : vector<1x32xf32> to vector<16x32xf32>
    %165 = arith.addf %162, %164 : vector<16x32xf32>
    %166 = arith.addf %165, %142 : vector<16x32xf32>
    %c10 = arith.constant 10 : index
    %c0_57 = arith.constant 0 : index
    %167 = vector.load %arg3[%c10, %c0_57] : memref<20x128xf32, #tpu.memory_space<vmem>>, vector<1x32xf32>
    %c11 = arith.constant 11 : index
    %c0_58 = arith.constant 0 : index
    %168 = vector.load %arg3[%c11, %c0_58] : memref<20x128xf32, #tpu.memory_space<vmem>>, vector<1x32xf32>
    %cst_59 = arith.constant dense<0.000000e+00> : vector<16xf32>
    %169 = vector.multi_reduction <add>, %166, %cst_59 [1] : vector<16x32xf32> to vector<16xf32>
    %170 = vector.shape_cast %169 : vector<16xf32> to vector<16x1xf32>
    %cst_60 = arith.constant 3.200000e+01 : f32
    %171 = vector.broadcast %cst_60 : f32 to vector<16x1xf32>
    %172 = arith.divf %170, %171 : vector<16x1xf32>
    %173 = vector.broadcast %172 : vector<16x1xf32> to vector<16x32xf32>
    %174 = arith.subf %166, %173 : vector<16x32xf32>
    %175 = arith.mulf %174, %174 : vector<16x32xf32>
    %cst_61 = arith.constant dense<0.000000e+00> : vector<16xf32>
    %176 = vector.multi_reduction <add>, %175, %cst_61 [1] : vector<16x32xf32> to vector<16xf32>
    %177 = vector.shape_cast %176 : vector<16xf32> to vector<16x1xf32>
    %cst_62 = arith.constant 3.200000e+01 : f32
    %178 = vector.broadcast %cst_62 : f32 to vector<16x1xf32>
    %179 = arith.divf %177, %178 : vector<16x1xf32>
    %180 = vector.broadcast %172 : vector<16x1xf32> to vector<16x32xf32>
    %181 = arith.subf %166, %180 : vector<16x32xf32>
    %cst_63 = arith.constant 9.99999996E-13 : f32
    %182 = vector.broadcast %cst_63 : f32 to vector<16x1xf32>
    %183 = arith.addf %179, %182 : vector<16x1xf32>
    %184 = math.rsqrt %183 : vector<16x1xf32>
    %185 = vector.broadcast %184 : vector<16x1xf32> to vector<16x32xf32>
    %186 = arith.mulf %181, %185 : vector<16x32xf32>
    %187 = vector.broadcast %167 : vector<1x32xf32> to vector<16x32xf32>
    %188 = arith.mulf %186, %187 : vector<16x32xf32>
    %189 = vector.broadcast %168 : vector<1x32xf32> to vector<16x32xf32>
    %190 = arith.addf %188, %189 : vector<16x32xf32>
    %c1_64 = arith.constant 1 : index
    %c0_65 = arith.constant 0 : index
    %c0_66 = arith.constant 0 : index
    %191 = vector.load %arg4[%c1_64, %c0_65, %c0_66] : memref<2x32x192xf32, #tpu.memory_space<vmem>>, vector<1x32x192xf32>
    %192 = vector.shape_cast %191 : vector<1x32x192xf32> to vector<32x192xf32>
    %193 = vector.extract_strided_slice %192 {offsets = [0, 0], sizes = [32, 96], strides = [1, 1]} : vector<32x192xf32> to vector<32x96xf32>
    %194 = vector.extract_strided_slice %192 {offsets = [0, 96], sizes = [32, 32], strides = [1, 1]} : vector<32x192xf32> to vector<32x32xf32>
    %195 = vector.extract_strided_slice %192 {offsets = [0, 128], sizes = [32, 64], strides = [1, 1]} : vector<32x192xf32> to vector<32x64xf32>
    %cst_67 = arith.constant dense<0.000000e+00> : vector<16x96xf32>
    %196 = tpu.matmul %190, %193, %cst_67 {dimension_numbers = #tpu.dot_dimension_numbers<[1], [0], [0], [1], [0, 0, 1, 1], [], []>} : vector<16x32xf32>, vector<32x96xf32>, vector<16x96xf32> -> vector<16x96xf32>
    %c12 = arith.constant 12 : index
    %c0_68 = arith.constant 0 : index
    %197 = vector.load %arg3[%c12, %c0_68] : memref<20x128xf32, #tpu.memory_space<vmem>>, vector<1x96xf32>
    %198 = vector.broadcast %197 : vector<1x96xf32> to vector<16x96xf32>
    %199 = arith.addf %196, %198 : vector<16x96xf32>
    %200 = vector.extract_strided_slice %199 {offsets = [0, 0], sizes = [16, 24], strides = [1, 1]} : vector<16x96xf32> to vector<16x24xf32>
    %201 = vector.extract_strided_slice %200 {offsets = [0, 0], sizes = [16, 8], strides = [1, 1]} : vector<16x24xf32> to vector<16x8xf32>
    %202 = vector.extract_strided_slice %200 {offsets = [0, 8], sizes = [16, 8], strides = [1, 1]} : vector<16x24xf32> to vector<16x8xf32>
    %203 = vector.extract_strided_slice %200 {offsets = [0, 16], sizes = [16, 8], strides = [1, 1]} : vector<16x24xf32> to vector<16x8xf32>
    %cst_69 = arith.constant dense<0.000000e+00> : vector<16x16xf32>
    %204 = tpu.matmul %201, %202, %cst_69 {dimension_numbers = #tpu.dot_dimension_numbers<[1], [1], [0], [0], [0, 0, 1, 0], [], []>} : vector<16x8xf32>, vector<16x8xf32>, vector<16x16xf32> -> vector<16x16xf32>
    %cst_70 = arith.constant 0.353553385 : f32
    %205 = vector.broadcast %cst_70 : f32 to vector<16x16xf32>
    %206 = arith.mulf %204, %205 : vector<16x16xf32>
    %207 = arith.addf %206, %27 : vector<16x16xf32>
    %cst_71 = arith.constant dense<0xFF800000> : vector<16xf32>
    %208 = vector.multi_reduction <maximumf>, %207, %cst_71 [1] : vector<16x16xf32> to vector<16xf32>
    %209 = vector.shape_cast %208 : vector<16xf32> to vector<16x1xf32>
    %210 = vector.broadcast %209 : vector<16x1xf32> to vector<16x16xf32>
    %211 = arith.subf %207, %210 : vector<16x16xf32>
    %212 = math.exp %211 : vector<16x16xf32>
    %cst_72 = arith.constant dense<0.000000e+00> : vector<16xf32>
    %213 = vector.multi_reduction <add>, %212, %cst_72 [1] : vector<16x16xf32> to vector<16xf32>
    %214 = vector.shape_cast %213 : vector<16xf32> to vector<16x1xf32>
    %215 = tpu.reciprocal %214 {approx = true} : vector<16x1xf32> -> vector<16x1xf32>
    %216 = vector.broadcast %215 : vector<16x1xf32> to vector<16x16xf32>
    %217 = arith.mulf %212, %216 : vector<16x16xf32>
    %cst_73 = arith.constant dense<0.000000e+00> : vector<16x8xf32>
    %218 = tpu.matmul %217, %203, %cst_73 {dimension_numbers = #tpu.dot_dimension_numbers<[1], [0], [0], [1], [0, 0, 1, 1], [], []>} : vector<16x16xf32>, vector<16x8xf32>, vector<16x8xf32> -> vector<16x8xf32>
    %219 = vector.extract_strided_slice %199 {offsets = [0, 24], sizes = [16, 24], strides = [1, 1]} : vector<16x96xf32> to vector<16x24xf32>
    %220 = vector.extract_strided_slice %219 {offsets = [0, 0], sizes = [16, 8], strides = [1, 1]} : vector<16x24xf32> to vector<16x8xf32>
    %221 = vector.extract_strided_slice %219 {offsets = [0, 8], sizes = [16, 8], strides = [1, 1]} : vector<16x24xf32> to vector<16x8xf32>
    %222 = vector.extract_strided_slice %219 {offsets = [0, 16], sizes = [16, 8], strides = [1, 1]} : vector<16x24xf32> to vector<16x8xf32>
    %cst_74 = arith.constant dense<0.000000e+00> : vector<16x16xf32>
    %223 = tpu.matmul %220, %221, %cst_74 {dimension_numbers = #tpu.dot_dimension_numbers<[1], [1], [0], [0], [0, 0, 1, 0], [], []>} : vector<16x8xf32>, vector<16x8xf32>, vector<16x16xf32> -> vector<16x16xf32>
    %cst_75 = arith.constant 0.353553385 : f32
    %224 = vector.broadcast %cst_75 : f32 to vector<16x16xf32>
    %225 = arith.mulf %223, %224 : vector<16x16xf32>
    %226 = arith.addf %225, %27 : vector<16x16xf32>
    %cst_76 = arith.constant dense<0xFF800000> : vector<16xf32>
    %227 = vector.multi_reduction <maximumf>, %226, %cst_76 [1] : vector<16x16xf32> to vector<16xf32>
    %228 = vector.shape_cast %227 : vector<16xf32> to vector<16x1xf32>
    %229 = vector.broadcast %228 : vector<16x1xf32> to vector<16x16xf32>
    %230 = arith.subf %226, %229 : vector<16x16xf32>
    %231 = math.exp %230 : vector<16x16xf32>
    %cst_77 = arith.constant dense<0.000000e+00> : vector<16xf32>
    %232 = vector.multi_reduction <add>, %231, %cst_77 [1] : vector<16x16xf32> to vector<16xf32>
    %233 = vector.shape_cast %232 : vector<16xf32> to vector<16x1xf32>
    %234 = tpu.reciprocal %233 {approx = true} : vector<16x1xf32> -> vector<16x1xf32>
    %235 = vector.broadcast %234 : vector<16x1xf32> to vector<16x16xf32>
    %236 = arith.mulf %231, %235 : vector<16x16xf32>
    %cst_78 = arith.constant dense<0.000000e+00> : vector<16x8xf32>
    %237 = tpu.matmul %236, %222, %cst_78 {dimension_numbers = #tpu.dot_dimension_numbers<[1], [0], [0], [1], [0, 0, 1, 1], [], []>} : vector<16x16xf32>, vector<16x8xf32>, vector<16x8xf32> -> vector<16x8xf32>
    %238 = vector.extract_strided_slice %199 {offsets = [0, 48], sizes = [16, 24], strides = [1, 1]} : vector<16x96xf32> to vector<16x24xf32>
    %239 = vector.extract_strided_slice %238 {offsets = [0, 0], sizes = [16, 8], strides = [1, 1]} : vector<16x24xf32> to vector<16x8xf32>
    %240 = vector.extract_strided_slice %238 {offsets = [0, 8], sizes = [16, 8], strides = [1, 1]} : vector<16x24xf32> to vector<16x8xf32>
    %241 = vector.extract_strided_slice %238 {offsets = [0, 16], sizes = [16, 8], strides = [1, 1]} : vector<16x24xf32> to vector<16x8xf32>
    %cst_79 = arith.constant dense<0.000000e+00> : vector<16x16xf32>
    %242 = tpu.matmul %239, %240, %cst_79 {dimension_numbers = #tpu.dot_dimension_numbers<[1], [1], [0], [0], [0, 0, 1, 0], [], []>} : vector<16x8xf32>, vector<16x8xf32>, vector<16x16xf32> -> vector<16x16xf32>
    %cst_80 = arith.constant 0.353553385 : f32
    %243 = vector.broadcast %cst_80 : f32 to vector<16x16xf32>
    %244 = arith.mulf %242, %243 : vector<16x16xf32>
    %245 = arith.addf %244, %27 : vector<16x16xf32>
    %cst_81 = arith.constant dense<0xFF800000> : vector<16xf32>
    %246 = vector.multi_reduction <maximumf>, %245, %cst_81 [1] : vector<16x16xf32> to vector<16xf32>
    %247 = vector.shape_cast %246 : vector<16xf32> to vector<16x1xf32>
    %248 = vector.broadcast %247 : vector<16x1xf32> to vector<16x16xf32>
    %249 = arith.subf %245, %248 : vector<16x16xf32>
    %250 = math.exp %249 : vector<16x16xf32>
    %cst_82 = arith.constant dense<0.000000e+00> : vector<16xf32>
    %251 = vector.multi_reduction <add>, %250, %cst_82 [1] : vector<16x16xf32> to vector<16xf32>
    %252 = vector.shape_cast %251 : vector<16xf32> to vector<16x1xf32>
    %253 = tpu.reciprocal %252 {approx = true} : vector<16x1xf32> -> vector<16x1xf32>
    %254 = vector.broadcast %253 : vector<16x1xf32> to vector<16x16xf32>
    %255 = arith.mulf %250, %254 : vector<16x16xf32>
    %cst_83 = arith.constant dense<0.000000e+00> : vector<16x8xf32>
    %256 = tpu.matmul %255, %241, %cst_83 {dimension_numbers = #tpu.dot_dimension_numbers<[1], [0], [0], [1], [0, 0, 1, 1], [], []>} : vector<16x16xf32>, vector<16x8xf32>, vector<16x8xf32> -> vector<16x8xf32>
    %257 = vector.extract_strided_slice %199 {offsets = [0, 72], sizes = [16, 24], strides = [1, 1]} : vector<16x96xf32> to vector<16x24xf32>
    %258 = vector.extract_strided_slice %257 {offsets = [0, 0], sizes = [16, 8], strides = [1, 1]} : vector<16x24xf32> to vector<16x8xf32>
    %259 = vector.extract_strided_slice %257 {offsets = [0, 8], sizes = [16, 8], strides = [1, 1]} : vector<16x24xf32> to vector<16x8xf32>
    %260 = vector.extract_strided_slice %257 {offsets = [0, 16], sizes = [16, 8], strides = [1, 1]} : vector<16x24xf32> to vector<16x8xf32>
    %cst_84 = arith.constant dense<0.000000e+00> : vector<16x16xf32>
    %261 = tpu.matmul %258, %259, %cst_84 {dimension_numbers = #tpu.dot_dimension_numbers<[1], [1], [0], [0], [0, 0, 1, 0], [], []>} : vector<16x8xf32>, vector<16x8xf32>, vector<16x16xf32> -> vector<16x16xf32>
    %cst_85 = arith.constant 0.353553385 : f32
    %262 = vector.broadcast %cst_85 : f32 to vector<16x16xf32>
    %263 = arith.mulf %261, %262 : vector<16x16xf32>
    %264 = arith.addf %263, %27 : vector<16x16xf32>
    %cst_86 = arith.constant dense<0xFF800000> : vector<16xf32>
    %265 = vector.multi_reduction <maximumf>, %264, %cst_86 [1] : vector<16x16xf32> to vector<16xf32>
    %266 = vector.shape_cast %265 : vector<16xf32> to vector<16x1xf32>
    %267 = vector.broadcast %266 : vector<16x1xf32> to vector<16x16xf32>
    %268 = arith.subf %264, %267 : vector<16x16xf32>
    %269 = math.exp %268 : vector<16x16xf32>
    %cst_87 = arith.constant dense<0.000000e+00> : vector<16xf32>
    %270 = vector.multi_reduction <add>, %269, %cst_87 [1] : vector<16x16xf32> to vector<16xf32>
    %271 = vector.shape_cast %270 : vector<16xf32> to vector<16x1xf32>
    %272 = tpu.reciprocal %271 {approx = true} : vector<16x1xf32> -> vector<16x1xf32>
    %273 = vector.broadcast %272 : vector<16x1xf32> to vector<16x16xf32>
    %274 = arith.mulf %269, %273 : vector<16x16xf32>
    %cst_88 = arith.constant dense<0.000000e+00> : vector<16x8xf32>
    %275 = tpu.matmul %274, %260, %cst_88 {dimension_numbers = #tpu.dot_dimension_numbers<[1], [0], [0], [1], [0, 0, 1, 1], [], []>} : vector<16x16xf32>, vector<16x8xf32>, vector<16x8xf32> -> vector<16x8xf32>
    %276 = tpu.concatenate %218, %237, %256, %275 in 1 : vector<16x8xf32>, vector<16x8xf32>, vector<16x8xf32>, vector<16x8xf32> -> vector<16x32xf32>
    %cst_89 = arith.constant dense<0.000000e+00> : vector<16x32xf32>
    %277 = tpu.matmul %276, %194, %cst_89 {dimension_numbers = #tpu.dot_dimension_numbers<[1], [0], [0], [1], [0, 0, 1, 1], [], []>} : vector<16x32xf32>, vector<32x32xf32>, vector<16x32xf32> -> vector<16x32xf32>
    %c13 = arith.constant 13 : index
    %c0_90 = arith.constant 0 : index
    %278 = vector.load %arg3[%c13, %c0_90] : memref<20x128xf32, #tpu.memory_space<vmem>>, vector<1x32xf32>
    %279 = vector.broadcast %278 : vector<1x32xf32> to vector<16x32xf32>
    %280 = arith.addf %277, %279 : vector<16x32xf32>
    %281 = arith.addf %280, %190 : vector<16x32xf32>
    %c14 = arith.constant 14 : index
    %c0_91 = arith.constant 0 : index
    %282 = vector.load %arg3[%c14, %c0_91] : memref<20x128xf32, #tpu.memory_space<vmem>>, vector<1x32xf32>
    %c15 = arith.constant 15 : index
    %c0_92 = arith.constant 0 : index
    %283 = vector.load %arg3[%c15, %c0_92] : memref<20x128xf32, #tpu.memory_space<vmem>>, vector<1x32xf32>
    %cst_93 = arith.constant dense<0.000000e+00> : vector<16xf32>
    %284 = vector.multi_reduction <add>, %281, %cst_93 [1] : vector<16x32xf32> to vector<16xf32>
    %285 = vector.shape_cast %284 : vector<16xf32> to vector<16x1xf32>
    %cst_94 = arith.constant 3.200000e+01 : f32
    %286 = vector.broadcast %cst_94 : f32 to vector<16x1xf32>
    %287 = arith.divf %285, %286 : vector<16x1xf32>
    %288 = vector.broadcast %287 : vector<16x1xf32> to vector<16x32xf32>
    %289 = arith.subf %281, %288 : vector<16x32xf32>
    %290 = arith.mulf %289, %289 : vector<16x32xf32>
    %cst_95 = arith.constant dense<0.000000e+00> : vector<16xf32>
    %291 = vector.multi_reduction <add>, %290, %cst_95 [1] : vector<16x32xf32> to vector<16xf32>
    %292 = vector.shape_cast %291 : vector<16xf32> to vector<16x1xf32>
    %cst_96 = arith.constant 3.200000e+01 : f32
    %293 = vector.broadcast %cst_96 : f32 to vector<16x1xf32>
    %294 = arith.divf %292, %293 : vector<16x1xf32>
    %295 = vector.broadcast %287 : vector<16x1xf32> to vector<16x32xf32>
    %296 = arith.subf %281, %295 : vector<16x32xf32>
    %cst_97 = arith.constant 9.99999996E-13 : f32
    %297 = vector.broadcast %cst_97 : f32 to vector<16x1xf32>
    %298 = arith.addf %294, %297 : vector<16x1xf32>
    %299 = math.rsqrt %298 : vector<16x1xf32>
    %300 = vector.broadcast %299 : vector<16x1xf32> to vector<16x32xf32>
    %301 = arith.mulf %296, %300 : vector<16x32xf32>
    %302 = vector.broadcast %282 : vector<1x32xf32> to vector<16x32xf32>
    %303 = arith.mulf %301, %302 : vector<16x32xf32>
    %304 = vector.broadcast %283 : vector<1x32xf32> to vector<16x32xf32>
    %305 = arith.addf %303, %304 : vector<16x32xf32>
    %cst_98 = arith.constant dense<0.000000e+00> : vector<16x64xf32>
    %306 = tpu.matmul %305, %195, %cst_98 {dimension_numbers = #tpu.dot_dimension_numbers<[1], [0], [0], [1], [0, 0, 1, 1], [], []>} : vector<16x32xf32>, vector<32x64xf32>, vector<16x64xf32> -> vector<16x64xf32>
    %c16 = arith.constant 16 : index
    %c0_99 = arith.constant 0 : index
    %307 = vector.load %arg3[%c16, %c0_99] : memref<20x128xf32, #tpu.memory_space<vmem>>, vector<1x64xf32>
    %308 = vector.broadcast %307 : vector<1x64xf32> to vector<16x64xf32>
    %309 = arith.addf %306, %308 : vector<16x64xf32>
    %cst_100 = arith.constant 5.000000e-01 : f32
    %310 = vector.broadcast %cst_100 : f32 to vector<16x64xf32>
    %311 = arith.mulf %310, %309 : vector<16x64xf32>
    %cst_101 = arith.constant 4.471500e-02 : f32
    %312 = vector.broadcast %cst_101 : f32 to vector<16x64xf32>
    %313 = arith.mulf %312, %309 : vector<16x64xf32>
    %314 = arith.mulf %313, %309 : vector<16x64xf32>
    %315 = arith.mulf %314, %309 : vector<16x64xf32>
    %316 = arith.addf %309, %315 : vector<16x64xf32>
    %cst_102 = arith.constant 0.797884583 : f32
    %317 = vector.broadcast %cst_102 : f32 to vector<16x64xf32>
    %318 = arith.mulf %317, %316 : vector<16x64xf32>
    %319 = math.tanh %318 : vector<16x64xf32>
    %cst_103 = arith.constant 1.000000e+00 : f32
    %320 = vector.broadcast %cst_103 : f32 to vector<16x64xf32>
    %321 = arith.addf %320, %319 : vector<16x64xf32>
    %322 = arith.mulf %311, %321 : vector<16x64xf32>
    %c1_104 = arith.constant 1 : index
    %c0_105 = arith.constant 0 : index
    %c0_106 = arith.constant 0 : index
    %323 = vector.load %arg5[%c1_104, %c0_105, %c0_106] : memref<2x64x32xf32, #tpu.memory_space<vmem>>, vector<1x64x32xf32>
    %324 = vector.shape_cast %323 : vector<1x64x32xf32> to vector<64x32xf32>
    %cst_107 = arith.constant dense<0.000000e+00> : vector<16x32xf32>
    %325 = tpu.matmul %322, %324, %cst_107 {dimension_numbers = #tpu.dot_dimension_numbers<[1], [0], [0], [1], [0, 0, 1, 1], [], []>} : vector<16x64xf32>, vector<64x32xf32>, vector<16x32xf32> -> vector<16x32xf32>
    %c17 = arith.constant 17 : index
    %c0_108 = arith.constant 0 : index
    %326 = vector.load %arg3[%c17, %c0_108] : memref<20x128xf32, #tpu.memory_space<vmem>>, vector<1x32xf32>
    %327 = vector.broadcast %326 : vector<1x32xf32> to vector<16x32xf32>
    %328 = arith.addf %325, %327 : vector<16x32xf32>
    %329 = arith.addf %328, %305 : vector<16x32xf32>
    %c18 = arith.constant 18 : index
    %c0_109 = arith.constant 0 : index
    %330 = vector.load %arg3[%c18, %c0_109] : memref<20x128xf32, #tpu.memory_space<vmem>>, vector<1x32xf32>
    %c19 = arith.constant 19 : index
    %c0_110 = arith.constant 0 : index
    %331 = vector.load %arg3[%c19, %c0_110] : memref<20x128xf32, #tpu.memory_space<vmem>>, vector<1x32xf32>
    %cst_111 = arith.constant dense<0.000000e+00> : vector<16xf32>
    %332 = vector.multi_reduction <add>, %329, %cst_111 [1] : vector<16x32xf32> to vector<16xf32>
    %333 = vector.shape_cast %332 : vector<16xf32> to vector<16x1xf32>
    %cst_112 = arith.constant 3.200000e+01 : f32
    %334 = vector.broadcast %cst_112 : f32 to vector<16x1xf32>
    %335 = arith.divf %333, %334 : vector<16x1xf32>
    %336 = vector.broadcast %335 : vector<16x1xf32> to vector<16x32xf32>
    %337 = arith.subf %329, %336 : vector<16x32xf32>
    %338 = arith.mulf %337, %337 : vector<16x32xf32>
    %cst_113 = arith.constant dense<0.000000e+00> : vector<16xf32>
    %339 = vector.multi_reduction <add>, %338, %cst_113 [1] : vector<16x32xf32> to vector<16xf32>
    %340 = vector.shape_cast %339 : vector<16xf32> to vector<16x1xf32>
    %cst_114 = arith.constant 3.200000e+01 : f32
    %341 = vector.broadcast %cst_114 : f32 to vector<16x1xf32>
    %342 = arith.divf %340, %341 : vector<16x1xf32>
    %343 = vector.broadcast %335 : vector<16x1xf32> to vector<16x32xf32>
    %344 = arith.subf %329, %343 : vector<16x32xf32>
    %cst_115 = arith.constant 9.99999996E-13 : f32
    %345 = vector.broadcast %cst_115 : f32 to vector<16x1xf32>
    %346 = arith.addf %342, %345 : vector<16x1xf32>
    %347 = math.rsqrt %346 : vector<16x1xf32>
    %348 = vector.broadcast %347 : vector<16x1xf32> to vector<16x32xf32>
    %349 = arith.mulf %344, %348 : vector<16x32xf32>
    %350 = vector.broadcast %330 : vector<1x32xf32> to vector<16x32xf32>
    %351 = arith.mulf %349, %350 : vector<16x32xf32>
    %352 = vector.broadcast %331 : vector<1x32xf32> to vector<16x32xf32>
    %353 = arith.addf %351, %352 : vector<16x32xf32>
    %354 = vector.extract_strided_slice %353 {offsets = [0, 0], sizes = [1, 32], strides = [1, 1]} : vector<16x32xf32> to vector<1x32xf32>
    %355 = vector.extract_strided_slice %353 {offsets = [8, 0], sizes = [1, 32], strides = [1, 1]} : vector<16x32xf32> to vector<1x32xf32>
    %356 = tpu.concatenate %354, %355 in 0 : vector<1x32xf32>, vector<1x32xf32> -> vector<2x32xf32>
    %c0_116 = arith.constant 0 : index
    %c0_117 = arith.constant 0 : index
    %357 = vector.load %arg6[%c0_116, %c0_117] : memref<32x160xf32, #tpu.memory_space<vmem>>, vector<32x32xf32>
    %cst_118 = arith.constant dense<0.000000e+00> : vector<2x32xf32>
    %358 = tpu.matmul %356, %357, %cst_118 {dimension_numbers = #tpu.dot_dimension_numbers<[1], [0], [0], [1], [0, 0, 1, 1], [], []>} : vector<2x32xf32>, vector<32x32xf32>, vector<2x32xf32> -> vector<2x32xf32>
    %c2 = arith.constant 2 : index
    %c0_119 = arith.constant 0 : index
    %359 = vector.load %arg3[%c2, %c0_119] : memref<20x128xf32, #tpu.memory_space<vmem>>, vector<1x32xf32>
    %360 = vector.broadcast %359 : vector<1x32xf32> to vector<2x32xf32>
    %361 = arith.addf %358, %360 : vector<2x32xf32>
    %362 = math.tanh %361 : vector<2x32xf32>
    %c0_120 = arith.constant 0 : index
    %c32 = arith.constant 32 : index
    %363 = vector.load %arg6[%c0_120, %c32] : memref<32x160xf32, #tpu.memory_space<vmem>>, vector<32x128xf32>
    %cst_121 = arith.constant dense<0.000000e+00> : vector<2x128xf32>
    %364 = tpu.matmul %362, %363, %cst_121 {dimension_numbers = #tpu.dot_dimension_numbers<[1], [0], [0], [1], [0, 0, 1, 1], [], []>} : vector<2x32xf32>, vector<32x128xf32>, vector<2x128xf32> -> vector<2x128xf32>
    %c3 = arith.constant 3 : index
    %c0_122 = arith.constant 0 : index
    %365 = vector.load %arg3[%c3, %c0_122] : memref<20x128xf32, #tpu.memory_space<vmem>>, vector<1x128xf32>
    %366 = vector.broadcast %365 : vector<1x128xf32> to vector<2x128xf32>
    %367 = arith.addf %364, %366 : vector<2x128xf32>
    %c0_123 = arith.constant 0 : index
    %c0_124 = arith.constant 0 : index
    %c0_125 = arith.constant 0 : index
    %368 = vector.load %arg7[%c0_123, %c0_124, %c0_125] : memref<1x2x128xf32, #tpu.memory_space<vmem>>, vector<1x2x128xf32>
    %369 = vector.shape_cast %368 : vector<1x2x128xf32> to vector<2x128xf32>
    %370 = vector.shape_cast %367 : vector<2x128xf32> to vector<1x2x128xf32>
    tpu.vector_store %arg7[%c0_123, %c0_124, %c0_125], %370 {strides = array<i32>} : memref<1x2x128xf32, #tpu.memory_space<vmem>>, vector<1x2x128xf32>,
    return
  }
  func.func @transform_0(%arg0: i32) -> (i32, i32, i32) {
    %c0_i32 = arith.constant 0 : i32
    %c0_i32_0 = arith.constant 0 : i32
    %c0_i32_1 = arith.constant 0 : i32
    return %arg0, %c0_i32, %c0_i32_0 : i32, i32, i32
  }
  func.func @transform_1(%arg0: i32) -> (i32, i32, i32) {
    %c0_i32 = arith.constant 0 : i32
    %c0_i32_0 = arith.constant 0 : i32
    %c0_i32_1 = arith.constant 0 : i32
    return %arg0, %c0_i32, %c0_i32_0 : i32, i32, i32
  }
  func.func @transform_2(%arg0: i32) -> (i32, i32) {
    %c0_i32 = arith.constant 0 : i32
    %c0_i32_0 = arith.constant 0 : i32
    %c0_i32_1 = arith.constant 0 : i32
    return %c0_i32, %c0_i32_0 : i32, i32
  }
  func.func @transform_3(%arg0: i32) -> (i32, i32, i32) {
    %c0_i32 = arith.constant 0 : i32
    %c0_i32_0 = arith.constant 0 : i32
    %c0_i32_1 = arith.constant 0 : i32
    %c0_i32_2 = arith.constant 0 : i32
    return %c0_i32, %c0_i32_0, %c0_i32_1 : i32, i32, i32
  }
  func.func @transform_4(%arg0: i32) -> (i32, i32, i32) {
    %c0_i32 = arith.constant 0 : i32
    %c0_i32_0 = arith.constant 0 : i32
    %c0_i32_1 = arith.constant 0 : i32
    %c0_i32_2 = arith.constant 0 : i32
    return %c0_i32, %c0_i32_0, %c0_i32_1 : i32, i32, i32
  }
  func.func @transform_5(%arg0: i32) -> (i32, i32) {
    %c0_i32 = arith.constant 0 : i32
    %c0_i32_0 = arith.constant 0 : i32
    %c0_i32_1 = arith.constant 0 : i32
    return %c0_i32, %c0_i32_0 : i32, i32
  }
  func.func @transform_6(%arg0: i32) -> (i32, i32, i32) {
    %c0_i32 = arith.constant 0 : i32
    %c0_i32_0 = arith.constant 0 : i32
    %c0_i32_1 = arith.constant 0 : i32
    return %arg0, %c0_i32, %c0_i32_0 : i32, i32, i32
  }
}

</mosaic_0001>

<bundles_post_ra>
// kernel: sentiment_model_forward.1
= control target key start
LH: loop header
LB: loop body
LE: loop exit
PB: predicated region body
PF: predicated region fallthrough
CT: control target
= control target key end

     0   :  { %vm27_vm0 = vcmask 261120   ;;  %vm169_vm1 = vcmask 64512   ;;  %s3807_s14 = smov 96   ;;  %s3808_s15 = smov 120   ;;  %vm257_vm3 = vcmask 130048   ;;  %vm1007_vm4 = vcmask 195584   ;;  %s4406_s0 = inlined_call_operand.vmem [shape: f32[1,16,32], index: 0, kind: input, shape index: {}]   ;;  %s4407_s3 = inlined_call_operand.vmem [shape: f32[2,32,192], index: 3, kind: input, shape index: {}]   ;;  %s4408_s2 = inlined_call_operand.vmem [shape: f32[20,128], index: 2, kind: input, shape index: {}]   ;;  %s4409_s1 = inlined_call_operand.vmem [shape: f32[1,16,16], index: 1, kind: input, shape index: {}]   ;;  %s4410_s4 = inlined_call_operand.vmem [shape: f32[2,64,32], index: 4, kind: input, shape index: {}]   ;;  %s4411_s5 = inlined_call_operand.vmem [shape: f32[32,160], index: 5, kind: input, shape index: {}]   ;;  %s4412_s6 = inlined_call_operand.vmem [shape: f32[1,2,128], index: 6, kind: output, shape index: {}]  }
   0x1   :  { %v23_v0 = vld [vmem:[%s4406_s0] sm:$0xff]  ;;  %v24_v1 = vld [vmem:[%s4406_s0 + $0x8] sm:$0xff]  ;;  %v3878_v15 = vld [vmem:[%s4407_s3 + $0x10] sm:$0xff]  ;;  %s3809_s16 = smov 104   ;;  %s3810_s21 = smov 88   ;;  %vm1271_vm5 = vcmask 523264  }
   0x2   :  { %v28_v2 = vsel %vm27_vm0, %v23_v0, 0.0  ;;  %v31_v3 = vsel %vm27_vm0, %v24_v1, 0.0  ;;  %v3873_v14 = vld [vmem:[%s4407_s3] sm:$0xff]  ;;  %v3892_v19 = vld [vmem:[%s4407_s3 + $0x30] sm:$0xff]  ;;  %vm3933_vm2 = vmpackc.low %vm169_vm1, %vm169_vm1  ;;  %s3811_s22 = smov 112   ;;  %s3812_s23 = smov 72  }
   0x3   :  { %29 = vadd.xlane.f32.xlu0 %v28_v2  ;;  %v3883_v16 = vld [vmem:[%s4407_s3 + $0x20] sm:$0xff]  ;;  %v3631_v17 = vpack.i.bf16 %v3878_v15, %v3873_v14  ;;  %v3401_v18 = vpack.c.bf16 %v3878_v15, %v3873_v14  ;;  %v3952_v55 = vld [vmem:[%s4409_s1 + $0x8] sm:$0xff]  ;;  %s3813_s24 = smov 80   ;;  %s3814_s0 = smov 64   ;;  %vm3823_vm6 = vmmov 0   ;;  %vm2844_vm7 = vcmask 785408  }
   0x4   :  { %v3405_v20 = vpack.c.bf16 %v3892_v19, %v3883_v16  ;;  %v2931_v28 = vld [vmem:[%s4408_s2] ss:$0 sm:$0xff]  ;;  %v2932_v30 = vld [vmem:[%s4408_s2 + $0x1] ss:$0 sm:$0xff]  ;;  %v2933_v37 = vld [vmem:[%s4408_s2 + $0x4] ss:$0 sm:$0xff] }
   0x5   :  { %3402 = vmatprep.subr.bf16.mxu0 %v3401_v18  ;;  %v3957_v58 = vld [vmem:[%s4409_s1] sm:$0xff]  ;;  %s3815_s25 = smov 56   ;;  %s3816_s26 = smov 48   ;;  %vm2722_vm8 = vcmask 1040384  }
   0x6   :  { %3404 = vmatpush3.bf16.msra.mxu0 %v3401_v18  ;;  %s3817_s27 = smov 40   ;;  %s3818_s28 = smov 32  }
   0x7   :  { %32 = vadd.xlane.f32.xlu0 %v31_v3  ;;  %3406 = vmatprep.subr.bf16.mxu0 %v3405_v20  ;;  %s3819_s29 = smov 8   ;;  %s3820_s30 = smov 16  }
   0x8   :  { %s3821_s7 = smov 24  }
   0xa   :  { %3408 = vmatpush3.bf16.msra.mxu0 %v3405_v20 }
  0x90   :  { %v30_v4 = vpop.xlane.xlu0 %29 }
  0x91   :  { %v35_v5 = vmul.f32 0.03125, %v30_v4 }
  0x93   :  { %v37_v6 = vsub.f32 %v23_v0, %v35_v5 }
  0x94   :  { %v33_v7 = vpop.xlane.xlu0 %32 }
  0x95   :  { %v36_v8 = vmul.f32 0.03125, %v33_v7  ;;  %v39_v9 = vmul.f32 %v37_v6, %v37_v6 }
  0x97   :  { %v38_v10 = vsub.f32 %v24_v1, %v36_v8  ;;  %v41_v11 = vsel %vm27_vm0, %v39_v9, 0.0 }
  0x98   :  { %42 = vadd.xlane.f32.xlu1 %v41_v11 }
  0x99   :  { %v40_v12 = vmul.f32 %v38_v10, %v38_v10 }
  0x9b   :  { %v44_v13 = vsel %vm27_vm0, %v40_v12, 0.0 }
  0x9c   :  { %45 = vadd.xlane.f32.xlu1 %v44_v13 }
 0x125   :  { %v43_v21 = vpop.xlane.xlu1 %42 }
 0x126   :  { %v47_v22 = vmul.f32 0.03125, %v43_v21 }
 0x128   :  { %v49_v23 = vadd.f32 1e-12, %v47_v22 }
 0x129   :  { %v46_v24 = vpop.xlane.xlu1 %45 }
 0x12a   :  { %3711 = vrsqrt.f32 %v49_v23  ;;  %v48_v25 = vmul.f32 0.03125, %v46_v24 }
 0x12c   :  { %v50_v26 = vadd.f32 1e-12, %v48_v25 }
 0x12e   :  { %3713 = vrsqrt.f32 %v50_v26 }
 0x134   :  { %v3712_v27 = vpop.eup %3711 }
 0x135   :  { %v53_v29 = vmul.f32 %v3712_v27, %v37_v6 }
 0x137   :  { %v59_v31 = vmul.f32 %v2931_v28, %v53_v29 }
 0x138   :  { %v3714_v32 = vpop.eup %3713 }
 0x139   :  { %v54_v33 = vmul.f32 %v3714_v32, %v38_v10  ;;  %v3902_v34 = vadd.f32 %v2932_v30, %v59_v31 }
 0x13b   :  { %v60_v35 = vmul.f32 %v2931_v28, %v54_v33  ;;  %3171 = vmatprep.mubr.msk.f32.mxu0 %vm27_vm0, %v3902_v34 }
 0x13d   :  { %v3906_v36 = vadd.f32 %v2932_v30, %v60_v35 }
 0x13f   :  { %3172 = vmatmul.mubr.msk.f32.vlgmr.msra.gmra.mrb[0].mxu0 %vm27_vm0, %v3906_v36 }
 0x212   :  { %v3173_v38 = vpop.f32.mrb[0].mxu0 }
 0x213   :  { %v3913_v39 = vadd.f32 %v3173_v38, %v2933_v37  ;;  %v154_v40 = vpop.f32.mrb[1].mxu0 }
 0x214   :  { %v3915_v41 = vadd.f32 %v2933_v37, %v154_v40 }
 0x216   :  { %3178 = vmatprep.mubr.msk.f32.mxu1 %vm169_vm1, %v3915_v41  ;;  %v3921_v42 = vpack.i.bf16 %v3913_v39, %v3915_v41 }
 0x218   :  { %3597 = vrot.lane.b32.xlu1 %v3921_v42, %s3807_s14  ;;  %3592 = vrot.lane.b32.xlu0 %v3921_v42, %s3808_s15 }
 0x21c   :  { %367 = vrot.lane.b32.xlu1 %v3915_v41, %s3809_s16 }
 0x220   :  { %369 = vrot.lane.b32.xlu1 %v3913_v39, %s3809_s16 }
 0x28a   :  { %v3598_v43 = vpop.permute.xlu1 %3597  ;;  %v3593_v44 = vpop.permute.xlu0 %3592 }
 0x28b   :  { %v3600_v45 = vunpack.i.h.bf16 %v3598_v43  ;;  %v3599_v46 = vunpack.i.l.bf16 %v3598_v43  ;;  %v3595_v47 = vunpack.i.h.bf16 %v3593_v44  ;;  %v3594_v48 = vunpack.i.l.bf16 %v3593_v44 }
 0x28d   :  { %v3409_v50 = vpack.c.bf16 %v3595_v47, %v3594_v48  ;;  %v3419_v51 = vpack.c.bf16 %v3600_v45, %v3599_v46 }
 0x28e   :  { %v368_v52 = vpop.permute.xlu1 %367 }
 0x28f   :  { %3411 = vmatprep.subr.msk.bf16.mxu1 %vm3933_vm2, %v3409_v50 }
 0x290   :  { %3414 = vmatpush3.bf16.xpose.msk.msra.mxu1 %vm3933_vm2, %v3409_v50 }
 0x291   :  { %3421 = vmatprep.subr.msk.bf16.mxu1 %vm3933_vm2, %v3419_v51 }
 0x292   :  { %v370_v53 = vpop.permute.xlu1 %369 }
 0x297   :  { %3179 = vmatmul.mubr.msk.f32.vlgmr.msra.gmra.mrb[0].mxu1 %vm169_vm1, %v3913_v39 }
 0x298   :  { %3424 = vmatpush3.bf16.xpose.msk.msra.mxu1 %vm3933_vm2, %v3419_v51  ;;  %3192 = vmatprep.mubr.msk.f32.mxu1 %vm169_vm1, %v368_v52 }
 0x29f   :  { %3193 = vmatmul.mubr.msk.f32.vlgmr.msra.gmra.mrb[2].mxu1 %vm169_vm1, %v370_v53 }
 0x36a   :  { %v3180_v54 = vpop.f32.mrb[0].mxu1 }
 0x36b   :  { %v254_v56 = vmul.f32 0.35355338, %v3180_v54  ;;  %v244_v57 = vpop.f32.mrb[1].mxu1 }
 0x36c   :  { %v253_v59 = vmul.f32 0.35355338, %v244_v57 }
 0x36d   :  { %v256_v60 = vadd.f32 %v254_v56, %v3952_v55 }
 0x36e   :  { %v255_v61 = vadd.f32 %v253_v59, %v3957_v58 }
 0x36f   :  { %v261_v62 = vsel %vm257_vm3, %v256_v60, -inf }
 0x370   :  { %262 = vmax.xlane.f32.xlu1 %v261_v62  ;;  %v258_v63 = vsel %vm257_vm3, %v255_v61, -inf }
 0x371   :  { %259 = vmax.xlane.f32.xlu0 %v258_v63 }
 0x372   :  { %v3194_v0 = vpop.f32.mrb[2].mxu1 }
 0x373   :  { %v449_v1 = vpop.f32.mrb[3].mxu1  ;;  %v459_v2 = vmul.f32 0.35355338, %v3194_v0 }
 0x374   :  { %v458_v3 = vmul.f32 0.35355338, %v449_v1 }
 0x375   :  { %v461_v6 = vadd.f32 %v459_v2, %v3952_v55 }
 0x376   :  { %v460_v4 = vadd.f32 %v458_v3, %v3957_v58 }
 0x377   :  { %v465_v7 = vsel %vm257_vm3, %v461_v6, -inf }
 0x378   :  { %v462_v5 = vsel %vm257_vm3, %v460_v4, -inf }
 0x379   :  { %463 = vmax.xlane.f32.xlu0 %v462_v5 }
 0x37d   :  { %466 = vmax.xlane.f32.xlu0 %v465_v7 }
 0x3fd   :  { %v263_v8 = vpop.xlane.xlu1 %262 }
 0x3fe   :  { %v265_v9 = vsub.f32 %v256_v60, %v263_v8  ;;  %v260_v10 = vpop.xlane.xlu0 %259 }
 0x3ff   :  { %v264_v11 = vsub.f32 %v255_v61, %v260_v10 }
 0x400   :  { %v268_v12 = vmul.f32 1.442695, %v265_v9 }
 0x401   :  { %v266_v13 = vmul.f32 1.442695, %v264_v11 }
 0x402   :  { %3715 = vpow2.f32 %v268_v12 }
 0x403   :  { %3717 = vpow2.f32 %v266_v13 }
 0x406   :  { %v464_v18 = vpop.xlane.xlu0 %463 }
 0x407   :  { %v468_v20 = vsub.f32 %v460_v4, %v464_v18 }
 0x409   :  { %v470_v21 = vmul.f32 1.442695, %v468_v20 }
 0x40a   :  { %v467_v22 = vpop.xlane.xlu0 %466 }
 0x40b   :  { %3719 = vpow2.f32 %v470_v21  ;;  %v469_v23 = vsub.f32 %v461_v6, %v467_v22 }
 0x40c   :  { %v3716_v24 = vpop.eup %3715 }
 0x40d   :  { %v3718_v25 = vpop.eup %3717  ;;  %v472_v26 = vmul.f32 1.442695, %v469_v23  ;;  %v273_v27 = vsel %vm257_vm3, %v3716_v24, 0.0 }
 0x40e   :  { %274 = vadd.xlane.f32.xlu1 %v273_v27  ;;  %v270_v28 = vsel %vm257_vm3, %v3718_v25, 0.0 }
 0x40f   :  { %3721 = vpow2.f32 %v472_v26  ;;  %271 = vadd.xlane.f32.xlu0 %v270_v28 }
 0x415   :  { %v3720_v29 = vpop.eup %3719 }
 0x416   :  { %v474_v30 = vsel %vm257_vm3, %v3720_v29, 0.0 }
 0x417   :  { %475 = vadd.xlane.f32.xlu0 %v474_v30 }
 0x419   :  { %v3722_v31 = vpop.eup %3721 }
 0x41a   :  { %v477_v32 = vsel %vm257_vm3, %v3722_v31, 0.0 }
 0x41b   :  { %478 = vadd.xlane.f32.xlu1 %v477_v32 }
 0x42c   :  { %3607 = vrot.lane.b32.xlu1 %v3921_v42, %s3810_s21 }
 0x42d   :  { %3602 = vrot.lane.b32.xlu0 %v3921_v42, %s3811_s22 }
 0x430   :  { %3612 = vrot.lane.b32.xlu1 %v3921_v42, %s3812_s23 }
 0x431   :  { %573 = vrot.lane.b32.xlu0 %v3913_v39, %s3813_s24 }
 0x434   :  { %571 = vrot.lane.b32.xlu1 %v3915_v41, %s3813_s24 }
 0x49b   :  { %v275_v35 = vpop.xlane.xlu1 %274 }
 0x49c   :  { %v272_v33 = vpop.xlane.xlu0 %271 }
 0x49d   :  { %3723 = vrcp.f32 %v272_v33 }
 0x49e   :  { %3725 = vrcp.f32 %v275_v35 }
 0x4a4   :  { %v476_v37 = vpop.xlane.xlu0 %475 }
 0x4a5   :  { %3727 = vrcp.f32 %v476_v37 }
 0x4a7   :  { %v3724_v38 = vpop.eup %3723 }
 0x4a8   :  { %v479_v40 = vpop.xlane.xlu1 %478  ;;  %v3603_v43 = vpop.permute.xlu0 %3602  ;;  %v278_v44 = vmul.f32 %v3724_v38, %v3718_v25 }
 0x4a9   :  { %3729 = vrcp.f32 %v479_v40  ;;  %v3605_v45 = vunpack.i.h.bf16 %v3603_v43  ;;  %v3604_v46 = vunpack.i.l.bf16 %v3603_v43  ;;  %v3726_v48 = vpop.eup %3725 }
 0x4aa   :  { %3185 = vmatprep.mubr.msk.f32.mxu0 %vm257_vm3, %v278_v44  ;;  %v279_v54 = vmul.f32 %v3726_v48, %v3716_v24 }
 0x4ab   :  { %v3415_v47 = vpack.c.bf16 %v3605_v45, %v3604_v46 }
 0x4ac   :  { %v3608_v50 = vpop.permute.xlu1 %3607  ;;  %v574_v2 = vpop.permute.xlu0 %573 }
 0x4ad   :  { %v3610_v51 = vunpack.i.h.bf16 %v3608_v50  ;;  %v3609_v52 = vunpack.i.l.bf16 %v3608_v50  ;;  %3416 = vmatprep.subr.bf16.mxu0 %v3415_v47 }
 0x4ae   :  { %3418 = vmatpush3.bf16.msra.mxu0 %v3415_v47 }
 0x4af   :  { %v3728_v53 = vpop.eup %3727  ;;  %v3425_v56 = vpack.c.bf16 %v3610_v51, %v3609_v52 }
 0x4b0   :  { %v3613_v57 = vpop.permute.xlu1 %3612  ;;  %v482_v59 = vmul.f32 %v3728_v53, %v3720_v29 }
 0x4b1   :  { %v3615_v60 = vunpack.i.h.bf16 %v3613_v57  ;;  %v3614_v61 = vunpack.i.l.bf16 %v3613_v57  ;;  %3186 = vmatmul.mubr.msk.f32.vlgmr.msra.gmra.mrb[2].mxu0 %vm257_vm3, %v279_v54  ;;  %3426 = vmatprep.subr.bf16.mxu0 %v3425_v56 }
 0x4b2   :  { %3428 = vmatpush3.bf16.msra.mxu0 %v3425_v56  ;;  %3199 = vmatprep.mubr.msk.f32.mxu0 %vm257_vm3, %v482_v59 }
 0x4b3   :  { %v3730_v62 = vpop.eup %3729  ;;  %v3429_v63 = vpack.c.bf16 %v3615_v60, %v3614_v61 }
 0x4b4   :  { %v483_v0 = vmul.f32 %v3730_v62, %v3722_v31  ;;  %v572_v1 = vpop.permute.xlu1 %571  ;;  %v3636_v62 = vpack.i.bf16 %v3892_v19, %v3883_v16 }
 0x4b5   :  { %3431 = vmatprep.subr.msk.bf16.mxu0 %vm3933_vm2, %v3429_v63 }
 0x4b6   :  { %3200 = vmatmul.mubr.msk.f32.vlgmr.msra.gmra.mrb[4].mxu0 %vm257_vm3, %v483_v0 }
 0x4b7   :  { %3206 = vmatprep.mubr.msk.f32.mxu0 %vm169_vm1, %v572_v1 }
 0x4bb   :  { %3434 = vmatpush3.bf16.xpose.msk.msra.mxu0 %vm3933_vm2, %v3429_v63 }
 0x4c2   :  { %3207 = vmatmul.mubr.msk.f32.vlgmr.msra.gmra.mrb[6].mxu0 %vm169_vm1, %v574_v2 }
 0x584   :  { %v3991_v3 = vpop.f32.mrb[2].mxu0 }
 0x585   :  { %v3993_v4 = vpop.f32.mrb[3].mxu0 }
 0x589   :  { %v3995_v5 = vpop.f32.mrb[4].mxu0 }
 0x58a   :  { %v3997_v6 = vpop.f32.mrb[5].mxu0 }
 0x595   :  { %v3208_v7 = vpop.f32.mrb[6].mxu0 }
 0x596   :  { %v663_v8 = vmul.f32 0.35355338, %v3208_v7  ;;  %v653_v9 = vpop.f32.mrb[7].mxu0 }
 0x597   :  { %v662_v10 = vmul.f32 0.35355338, %v653_v9 }
 0x598   :  { %v665_v11 = vadd.f32 %v663_v8, %v3952_v55 }
 0x599   :  { %v664_v12 = vadd.f32 %v662_v10, %v3957_v58 }
 0x59a   :  { %v669_v13 = vsel %vm257_vm3, %v665_v11, -inf }
 0x59b   :  { %670 = vmax.xlane.f32.xlu0 %v669_v13  ;;  %v666_v18 = vsel %vm257_vm3, %v664_v12, -inf }
 0x59c   :  { %667 = vmax.xlane.f32.xlu1 %v666_v18 }
 0x5ad   :  { %3617 = vrot.lane.b32.xlu1 %v3921_v42, %s3814_s0 }
 0x5b1   :  { %775 = vrot.lane.b32.xlu1 %v3915_v41, %s3815_s25 }
 0x5b5   :  { %777 = vrot.lane.b32.xlu1 %v3913_v39, %s3815_s25 }
 0x628   :  { %v671_v20 = vpop.xlane.xlu0 %670 }
 0x629   :  { %v673_v21 = vsub.f32 %v665_v11, %v671_v20  ;;  %v668_v22 = vpop.xlane.xlu1 %667 }
 0x62a   :  { %v672_v23 = vsub.f32 %v664_v12, %v668_v22 }
 0x62b   :  { %v676_v24 = vmul.f32 1.442695, %v673_v21 }
 0x62c   :  { %v674_v25 = vmul.f32 1.442695, %v672_v23 }
 0x62d   :  { %3731 = vpow2.f32 %v676_v24  ;;  %v3618_v26 = vpop.permute.xlu1 %3617 }
 0x62e   :  { %v3620_v27 = vunpack.i.h.bf16 %v3618_v26  ;;  %v3619_v28 = vunpack.i.l.bf16 %v3618_v26  ;;  %3733 = vpow2.f32 %v674_v25 }
 0x630   :  { %v3435_v29 = vpack.c.bf16 %v3620_v27, %v3619_v28 }
 0x631   :  { %v776_v47 = vpop.permute.xlu1 %775 }
 0x632   :  { %3436 = vmatprep.subr.bf16.mxu1 %v3435_v29 }
 0x633   :  { %3438 = vmatpush3.bf16.msra.mxu1 %v3435_v29 }
 0x635   :  { %v778_v48 = vpop.permute.xlu1 %777 }
 0x637   :  { %v3732_v30 = vpop.eup %3731 }
 0x638   :  { %v681_v41 = vsel %vm257_vm3, %v3732_v30, 0.0  ;;  %v3734_v31 = vpop.eup %3733 }
 0x639   :  { %682 = vadd.xlane.f32.xlu0 %v681_v41  ;;  %v678_v39 = vsel %vm257_vm3, %v3734_v31, 0.0 }
 0x63d   :  { %679 = vadd.xlane.f32.xlu0 %v678_v39 }
 0x653   :  { %3622 = vrot.lane.b32.xlu0 %v3921_v42, %s3816_s26 }
 0x6c6   :  { %v683_v32 = vpop.xlane.xlu0 %682 }
 0x6c7   :  { %3735 = vrcp.f32 %v683_v32 }
 0x6ca   :  { %v680_v33 = vpop.xlane.xlu0 %679 }
 0x6cb   :  { %3737 = vrcp.f32 %v680_v33 }
 0x6ce   :  { %v3623_v35 = vpop.permute.xlu0 %3622 }
 0x6cf   :  { %v3625_v37 = vunpack.i.h.bf16 %v3623_v35  ;;  %v3624_v38 = vunpack.i.l.bf16 %v3623_v35 }
 0x6d1   :  { %v3439_v40 = vpack.c.bf16 %v3625_v37, %v3624_v38  ;;  %v3736_v43 = vpop.eup %3735 }
 0x6d2   :  { %v687_v46 = vmul.f32 %v3736_v43, %v3732_v30 }
 0x6d3   :  { %3441 = vmatprep.subr.msk.bf16.mxu1 %vm3933_vm2, %v3439_v40 }
 0x6d5   :  { %v3738_v44 = vpop.eup %3737 }
 0x6d6   :  { %v686_v45 = vmul.f32 %v3738_v44, %v3734_v31 }
 0x6d8   :  { %3213 = vmatprep.mubr.msk.f32.mxu1 %vm257_vm3, %v686_v45 }
 0x6d9   :  { %3214 = vmatmul.mubr.msk.f32.vlgmr.msra.gmra.mrb[4].mxu1 %vm257_vm3, %v687_v46 }
 0x6da   :  { %3444 = vmatpush3.bf16.xpose.msk.msra.mxu1 %vm3933_vm2, %v3439_v40  ;;  %3220 = vmatprep.mubr.msk.f32.mxu1 %vm169_vm1, %v776_v47 }
 0x6e1   :  { %3221 = vmatmul.mubr.msk.f32.vlgmr.msra.gmra.mrb[6].mxu1 %vm169_vm1, %v778_v48 }
 0x7ac   :  { %v3215_v50 = vpop.f32.mrb[4].mxu1 }
 0x7ad   :  { %v766_v51 = vpop.f32.mrb[5].mxu1 }
 0x7b4   :  { %v3222_v52 = vpop.f32.mrb[6].mxu1 }
 0x7b5   :  { %v867_v53 = vmul.f32 0.35355338, %v3222_v52  ;;  %v857_v54 = vpop.f32.mrb[7].mxu1 }
 0x7b6   :  { %v866_v56 = vmul.f32 0.35355338, %v857_v54 }
 0x7b7   :  { %v869_v57 = vadd.f32 %v867_v53, %v3952_v55 }
 0x7b8   :  { %v868_v59 = vadd.f32 %v866_v56, %v3957_v58 }
 0x7b9   :  { %v873_v60 = vsel %vm257_vm3, %v869_v57, -inf }
 0x7ba   :  { %874 = vmax.xlane.f32.xlu0 %v873_v60  ;;  %v870_v61 = vsel %vm257_vm3, %v868_v59, -inf }
 0x7bb   :  { %871 = vmax.xlane.f32.xlu1 %v870_v61 }
 0x7cc   :  { %3627 = vrot.lane.b32.xlu1 %v3921_v42, %s3817_s27 }
 0x7d0   :  { %3637 = vrot.lane.b32.xlu1 %v3636_v62, %s3818_s28 }
 0x7d4   :  { %981 = vrot.lane.b32.xlu1 %v3997_v6, %s3819_s29 }
 0x7d8   :  { %983 = vrot.lane.b32.xlu1 %v3995_v5, %s3819_s29 }
 0x7dc   :  { %991 = vrot.lane.b32.xlu1 %v3215_v50, %s3820_s30 }
 0x847   :  { %v875_v63 = vpop.xlane.xlu0 %874 }
 0x848   :  { %v877_v0 = vsub.f32 %v869_v57, %v875_v63  ;;  %v872_v1 = vpop.xlane.xlu1 %871 }
 0x849   :  { %v876_v42 = vsub.f32 %v868_v59, %v872_v1 }
 0x84a   :  { %v880_v2 = vmul.f32 1.442695, %v877_v0  ;;  %v72_v0 = vld [vmem:[%s4407_s3 + $0x18] sm:$0xff] }
 0x84b   :  { %v878_v7 = vmul.f32 1.442695, %v876_v42  ;;  %v74_v42 = vld [vmem:[%s4407_s3 + $0x28] sm:$0xff] }
 0x84c   :  { %v3628_v16 = vpop.permute.xlu1 %3627 }
 0x84d   :  { %3739 = vpow2.f32 %v878_v7  ;;  %v3630_v19 = vunpack.i.h.bf16 %v3628_v16  ;;  %v3629_v8 = vunpack.i.l.bf16 %v3628_v16 }
 0x84e   :  { %3741 = vpow2.f32 %v880_v2  ;;  %v76_v2 = vld [vmem:[%s4407_s3 + $0x38] sm:$0xff] }
 0x84f   :  { %v3445_v9 = vpack.c.bf16 %v3630_v19, %v3629_v8  ;;  %v3461_v7 = vpack.c.bf16 %v76_v2, %v74_v42 }
 0x850   :  { %v3638_v23 = vpop.permute.xlu1 %3637 }
 0x851   :  { %3446 = vmatprep.subr.bf16.mxu0 %v3445_v9  ;;  %v3640_v25 = vunpack.i.h.bf16 %v3638_v23  ;;  %v3639_v26 = vunpack.i.l.bf16 %v3638_v23 }
 0x852   :  { %3448 = vmatpush3.bf16.msra.mxu0 %v3445_v9 }
 0x853   :  { %v3453_v15 = vpack.c.bf16 %v3640_v25, %v3639_v26  ;;  %v1258_v25 = vld [vmem:[%s4410_s4] sm:$0xff]  ;;  %v1259_v26 = vld [vmem:[%s4410_s4 + $0x8] sm:$0xff] }
 0x854   :  { %v982_v30 = vpop.permute.xlu1 %981 }
 0x855   :  { %v1003_v32 = vsel %vm169_vm1, %v3993_v4, %v982_v30  ;;  %v2960_v4 = vld [vmem:[%s4408_s2 + $0x5] ss:$0 sm:$0xff] }
 0x857   :  { %v3740_v6 = vpop.eup %3739 }
 0x858   :  { %v882_v5 = vsel %vm257_vm3, %v3740_v6, 0.0  ;;  %v3742_v10 = vpop.eup %3741  ;;  %v984_v41 = vpop.permute.xlu1 %983 }
 0x859   :  { %883 = vadd.xlane.f32.xlu0 %v882_v5  ;;  %v885_v11 = vsel %vm257_vm3, %v3742_v10, 0.0  ;;  %v1004_v35 = vsel %vm169_vm1, %v3991_v3, %v984_v41  ;;  %v1264_v41 = vld [vmem:[%s4410_s4 + $0x30] sm:$0xff] }
 0x85c   :  { %v992_v31 = vpop.permute.xlu1 %991 }
 0x85d   :  { %886 = vadd.xlane.f32.xlu0 %v885_v11  ;;  %v1006_v40 = vsel %vm257_vm3, %v1004_v35, %v992_v31  ;;  %v2963_v11 = vld [vmem:[%s4408_s2 + $0x6] ss:$0 sm:$0xff]  ;;  %v1265_v31 = vld [vmem:[%s4410_s4 + $0x38] sm:$0xff] }
 0x873   :  { %3632 = vrot.lane.b32.xlu0 %v3631_v17, %s3818_s28 }
 0x877   :  { %989 = vrot.lane.b32.xlu0 %v766_v51, %s3820_s30 }
 0x8e6   :  { %v884_v12 = vpop.xlane.xlu0 %883 }
 0x8e7   :  { %3743 = vrcp.f32 %v884_v12 }
 0x8ea   :  { %v887_v13 = vpop.xlane.xlu0 %886 }
 0x8eb   :  { %3745 = vrcp.f32 %v887_v13  ;;  %v2964_v13 = vld [vmem:[%s4408_s2 + $0x7] ss:$0 sm:$0xff] }
 0x8ee   :  { %v3633_v18 = vpop.permute.xlu0 %3632 }
 0x8ef   :  { %v3635_v20 = vunpack.i.h.bf16 %v3633_v18  ;;  %v3634_v21 = vunpack.i.l.bf16 %v3633_v18 }
 0x8f1   :  { %v3744_v22 = vpop.eup %3743  ;;  %v3449_v24 = vpack.c.bf16 %v3635_v20, %v3634_v21 }
 0x8f2   :  { %v890_v27 = vmul.f32 %v3744_v22, %v3740_v6  ;;  %v990_v39 = vpop.permute.xlu0 %989 }
 0x8f3   :  { %3450 = vmatprep.subr.bf16.mxu0 %v3449_v24  ;;  %v1005_v37 = vsel %vm257_vm3, %v1003_v32, %v990_v39  ;;  %v3477_v39 = vpack.c.bf16 %v1265_v31, %v1264_v41  ;;  %v2965_v32 = vld [vmem:[%s4408_s2 + $0x8] ss:$0 sm:$0xff]  ;;  %v2972_v31 = vld [vmem:[%s4408_s2 + $0xb] ss:$0 sm:$0xff] }
 0x8f4   :  { %3227 = vmatprep.mubr.msk.f32.mxu0 %vm257_vm3, %v890_v27  ;;  %v3465_v27 = vpack.c.bf16 %v1259_v26, %v1258_v25 }
 0x8f5   :  { %v3746_v14 = vpop.eup %3745 }
 0x8f6   :  { %v891_v17 = vmul.f32 %v3746_v14, %v3742_v10  ;;  %v1260_v14 = vld [vmem:[%s4410_s4 + $0x10] sm:$0xff] }
 0x8f8   :  { %3228 = vmatmul.mubr.msk.f32.vlgmr.msra.gmra.mrb[8].mxu0 %vm257_vm3, %v891_v17  ;;  %v1262_v17 = vld [vmem:[%s4410_s4 + $0x20] sm:$0xff] }
 0x8f9   :  { %3452 = vmatpush3.bf16.msra.mxu0 %v3449_v24 }
 0x8fa   :  { %3454 = vmatprep.subr.bf16.mxu0 %v3453_v15 }
 0x8fd   :  { %3456 = vmatpush3.bf16.msra.mxu0 %v3453_v15  ;;  %v1261_v15 = vld [vmem:[%s4410_s4 + $0x18] sm:$0xff] }
 0x8fe   :  { %3466 = vmatprep.subr.bf16.mxu0 %v3465_v27 }
 0x9cb   :  { %v3229_v28 = vpop.f32.mrb[8].mxu0 }
 0x9cc   :  { %999 = vrot.lane.b32.xlu1 %v3229_v28, %s3821_s7  ;;  %v970_v29 = vpop.f32.mrb[9].mxu0  ;;  %v3469_v28 = vpack.c.bf16 %v1261_v15, %v1260_v14 }
 0x9cd   :  { %997 = vrot.lane.b32.xlu0 %v970_v29, %s3821_s7  ;;  %v1263_v29 = vld [vmem:[%s4410_s4 + $0x28] sm:$0xff] }
 0x9ce   :  { %v3473_v30 = vpack.c.bf16 %v1263_v29, %v1262_v17 }
 0xa3e   :  { %v1000_v33 = vpop.permute.xlu1 %999 }
 0xa3f   :  { %v998_v38 = vpop.permute.xlu0 %997  ;;  %v1009_v44 = vsel %vm1007_vm4, %v1006_v40, %v1000_v33 }
 0xa40   :  { %v1008_v43 = vsel %vm1007_vm4, %v1005_v37, %v998_v38 }
 0xa41   :  { %3238 = vmatprep.mubr.msk.f32.mxu0 %vm27_vm0, %v1008_v43 }
 0xa42   :  { %3239 = vmatmul.mubr.msk.f32.vlgmr.msra.gmra.mrb[10].mxu0 %vm27_vm0, %v1009_v44 }
 0xa43   :  { %3468 = vmatpush3.bf16.msra.mxu0 %v3465_v27 }
 0xa44   :  { %3470 = vmatprep.subr.bf16.mxu0 %v3469_v28 }
 0xa47   :  { %3472 = vmatpush3.bf16.msra.mxu0 %v3469_v28  ;;  %v2971_v28 = vld [vmem:[%s4408_s2 + $0xa] ss:$0 sm:$0xff] }
 0xa48   :  { %3474 = vmatprep.subr.bf16.mxu0 %v3473_v30 }
 0xa4b   :  { %3476 = vmatpush3.bf16.msra.mxu0 %v3473_v30 }
 0xa4c   :  { %3478 = vmatprep.subr.bf16.mxu0 %v3477_v39 }
 0xa4f   :  { %3480 = vmatpush3.bf16.msra.mxu0 %v3477_v39 }
 0xb15   :  { %v3240_v45 = vpop.f32.mrb[10].mxu0 }
 0xb16   :  { %v1109_v46 = vadd.f32 %v3240_v45, %v2960_v4  ;;  %v1103_v3 = vpop.f32.mrb[11].mxu0 }
 0xb17   :  { %v1104_v47 = vadd.f32 %v2960_v4, %v1103_v3 }
 0xb18   :  { %v1113_v48 = vadd.f32 %v1109_v46, %v3906_v36 }
 0xb19   :  { %v1112_v50 = vadd.f32 %v1104_v47, %v3902_v34  ;;  %v70_v34 = vld [vmem:[%s4407_s3 + $0x8] sm:$0xff] }
 0xb1a   :  { %v1119_v51 = vsel %vm27_vm0, %v1113_v48, 0.0  ;;  %v3457_v1 = vpack.c.bf16 %v72_v0, %v70_v34 }
 0xb1b   :  { %1120 = vadd.xlane.f32.xlu1 %v1119_v51  ;;  %v1116_v52 = vsel %vm27_vm0, %v1112_v50, 0.0 }
 0xb1c   :  { %1117 = vadd.xlane.f32.xlu0 %v1116_v52  ;;  %3458 = vmatprep.subr.bf16.mxu1 %v3457_v1 }
 0xb1d   :  { %3460 = vmatpush3.bf16.msra.mxu1 %v3457_v1 }
 0xb1e   :  { %3462 = vmatprep.subr.bf16.mxu1 %v3461_v7 }
 0xb21   :  { %3464 = vmatpush3.bf16.msra.mxu1 %v3461_v7 }
 0xba8   :  { %v1121_v53 = vpop.xlane.xlu1 %1120 }
 0xba9   :  { %v1123_v54 = vmul.f32 0.03125, %v1121_v53  ;;  %v1118_v56 = vpop.xlane.xlu0 %1117 }
 0xbaa   :  { %v1122_v57 = vmul.f32 0.03125, %v1118_v56 }
 0xbab   :  { %v1125_v59 = vsub.f32 %v1113_v48, %v1123_v54 }
 0xbac   :  { %v1124_v60 = vsub.f32 %v1112_v50, %v1122_v57 }
 0xbad   :  { %v1127_v63 = vmul.f32 %v1125_v59, %v1125_v59 }
 0xbae   :  { %v1126_v61 = vmul.f32 %v1124_v60, %v1124_v60 }
 0xbaf   :  { %v1131_v36 = vsel %vm27_vm0, %v1127_v63, 0.0 }
 0xbb0   :  { %v1128_v62 = vsel %vm27_vm0, %v1126_v61, 0.0  ;;  %v2968_v61 = vld [vmem:[%s4408_s2 + $0x9] ss:$0 sm:$0xff] }
 0xbb1   :  { %1129 = vadd.xlane.f32.xlu0 %v1128_v62 }
 0xbb5   :  { %1132 = vadd.xlane.f32.xlu0 %v1131_v36 }
 0xc3e   :  { %v1130_v16 = vpop.xlane.xlu0 %1129 }
 0xc3f   :  { %v1134_v19 = vmul.f32 0.03125, %v1130_v16 }
 0xc41   :  { %v1136_v8 = vadd.f32 1e-12, %v1134_v19 }
 0xc42   :  { %v1133_v9 = vpop.xlane.xlu0 %1132 }
 0xc43   :  { %3747 = vrsqrt.f32 %v1136_v8  ;;  %v1135_v6 = vmul.f32 0.03125, %v1133_v9 }
 0xc45   :  { %v1137_v5 = vadd.f32 1e-12, %v1135_v6 }
 0xc47   :  { %3749 = vrsqrt.f32 %v1137_v5 }
 0xc4d   :  { %v3748_v10 = vpop.eup %3747 }
 0xc4e   :  { %v1140_v12 = vmul.f32 %v3748_v10, %v1124_v60 }
 0xc50   :  { %v1146_v18 = vmul.f32 %v2963_v11, %v1140_v12 }
 0xc51   :  { %v3750_v20 = vpop.eup %3749 }
 0xc52   :  { %v1141_v21 = vmul.f32 %v3750_v20, %v1125_v59  ;;  %v1152_v22 = vadd.f32 %v2964_v13, %v1146_v18  ;;  %v4129_v18 = vld [vmem:[%s4407_s3 + $0x50] sm:$0xff] }
 0xc54   :  { %v1147_v23 = vmul.f32 %v2963_v11, %v1141_v21  ;;  %3249 = vmatprep.mubr.msk.f32.mxu1 %vm27_vm0, %v1152_v22  ;;  %v4136_v21 = vld [vmem:[%s4407_s3 + $0x60] sm:$0xff] }
 0xc56   :  { %v1153_v24 = vadd.f32 %v2964_v13, %v1147_v23  ;;  %v4124_v13 = vld [vmem:[%s4407_s3 + $0x40] sm:$0xff] }
 0xc57   :  { %v3481_v20 = vpack.c.bf16 %v4129_v18, %v4124_v13 }
 0xc58   :  { %3250 = vmatmul.mubr.msk.f32.vlgmr.msra.gmra.mrb[8].mxu1 %vm27_vm0, %v1153_v24 }
 0xc59   :  { %3482 = vmatprep.subr.bf16.mxu1 %v3481_v20 }
 0xc5a   :  { %3484 = vmatpush3.bf16.msra.mxu1 %v3481_v20 }
 0xd2b   :  { %v3251_v33 = vpop.f32.mrb[8].mxu1 }
 0xd2c   :  { %v1237_v35 = vadd.f32 %v3251_v33, %v2965_v32  ;;  %v1231_v37 = vpop.f32.mrb[9].mxu1 }
 0xd2d   :  { %v1232_v38 = vadd.f32 %v2965_v32, %v1231_v37  ;;  %v2981_v37 = vld [vmem:[%s4408_s2 + $0xc] ss:$0 sm:$0xff] }
 0xd2e   :  { %v1243_v40 = vmul.f32 0.044715, %v1237_v35  ;;  %v1241_v57 = vmul.f32 0.5, %v1237_v35 }
 0xd2f   :  { %v1242_v43 = vmul.f32 0.044715, %v1232_v38  ;;  %v1240_v54 = vmul.f32 0.5, %v1232_v38 }
 0xd30   :  { %v1245_v44 = vmul.f32 %v1243_v40, %v1237_v35 }
 0xd31   :  { %v1244_v4 = vmul.f32 %v1242_v43, %v1232_v38 }
 0xd32   :  { %v1247_v45 = vmul.f32 %v1245_v44, %v1237_v35 }
 0xd33   :  { %v1246_v46 = vmul.f32 %v1244_v4, %v1232_v38 }
 0xd34   :  { %v1249_v3 = vadd.f32 %v1247_v45, %v1237_v35 }
 0xd35   :  { %v1248_v47 = vadd.f32 %v1246_v46, %v1232_v38 }
 0xd36   :  { %v1251_v48 = vmul.f32 0.7978846, %v1249_v3 }
 0xd37   :  { %v1250_v50 = vmul.f32 0.7978846, %v1248_v47 }
 0xd38   :  { %3751 = vtanh.f32 %v1251_v48 }
 0xd39   :  { %3753 = vtanh.f32 %v1250_v50 }
 0xd42   :  { %v3752_v51 = vpop.eup %3751 }
 0xd43   :  { %v3754_v52 = vpop.eup %3753  ;;  %v1255_v53 = vadd.f32 1.0, %v3752_v51 }
 0xd44   :  { %v1254_v56 = vadd.f32 1.0, %v3754_v52 }
 0xd45   :  { %v1257_v60 = vmul.f32 %v1255_v53, %v1241_v57 }
 0xd46   :  { %v1256_v59 = vmul.f32 %v1254_v56, %v1240_v54 }
 0xd48   :  { %3268 = vmatprep.mubr.msk.f32.mxu0 %vm1271_vm5, %v1256_v59 }
 0xd49   :  { %3269 = vmatmul.mubr.msk.f32.vlgmr.msra.gmra.mrb[12].mxu0 %vm1271_vm5, %v1257_v60 }
 0xe1c   :  { %v3270_v62 = vpop.f32.mrb[12].mxu0 }
 0xe1d   :  { %v1350_v63 = vadd.f32 %v3270_v62, %v2968_v61  ;;  %v1344_v36 = vpop.f32.mrb[13].mxu0 }
 0xe1e   :  { %v1345_v34 = vadd.f32 %v2968_v61, %v1344_v36 }
 0xe1f   :  { %v1354_v0 = vadd.f32 %v1350_v63, %v1153_v24 }
 0xe20   :  { %v1353_v1 = vadd.f32 %v1345_v34, %v1152_v22  ;;  %v4141_v22 = vld [vmem:[%s4407_s3 + $0x70] sm:$0xff] }
 0xe21   :  { %v1360_v42 = vsel %vm27_vm0, %v1354_v0, 0.0  ;;  %v3485_v23 = vpack.c.bf16 %v4141_v22, %v4136_v21  ;;  %v3686_v49 = vpack.i.bf16 %v4141_v22, %v4136_v21 }
 0xe22   :  { %1361 = vadd.xlane.f32.xlu1 %v1360_v42  ;;  %v1357_v2 = vsel %vm27_vm0, %v1353_v1, 0.0 }
 0xe23   :  { %1358 = vadd.xlane.f32.xlu0 %v1357_v2  ;;  %3486 = vmatprep.subr.bf16.mxu1 %v3485_v23 }
 0xe24   :  { %3488 = vmatpush3.bf16.msra.mxu1 %v3485_v23 }
 0xeaf   :  { %v1362_v7 = vpop.xlane.xlu1 %1361 }
 0xeb0   :  { %v1364_v16 = vmul.f32 0.03125, %v1362_v7  ;;  %v1359_v19 = vpop.xlane.xlu0 %1358 }
 0xeb1   :  { %v1363_v8 = vmul.f32 0.03125, %v1359_v19 }
 0xeb2   :  { %v1366_v9 = vsub.f32 %v1354_v0, %v1364_v16 }
 0xeb3   :  { %v1365_v6 = vsub.f32 %v1353_v1, %v1363_v8 }
 0xeb4   :  { %v1368_v5 = vmul.f32 %v1366_v9, %v1366_v9 }
 0xeb5   :  { %v1367_v10 = vmul.f32 %v1365_v6, %v1365_v6 }
 0xeb6   :  { %v1372_v11 = vsel %vm27_vm0, %v1368_v5, 0.0 }
 0xeb7   :  { %1373 = vadd.xlane.f32.xlu1 %v1372_v11  ;;  %v1369_v12 = vsel %vm27_vm0, %v1367_v10, 0.0 }
 0xeb8   :  { %1370 = vadd.xlane.f32.xlu0 %v1369_v12 }
 0xf44   :  { %v1374_v24 = vpop.xlane.xlu1 %1373 }
 0xf45   :  { %v1376_v25 = vmul.f32 0.03125, %v1374_v24  ;;  %v1371_v26 = vpop.xlane.xlu0 %1370 }
 0xf46   :  { %v1375_v27 = vmul.f32 0.03125, %v1371_v26 }
 0xf47   :  { %v1378_v14 = vadd.f32 1e-12, %v1376_v25 }
 0xf48   :  { %v1377_v15 = vadd.f32 1e-12, %v1375_v27 }
 0xf49   :  { %3755 = vrsqrt.f32 %v1378_v14 }
 0xf4a   :  { %3757 = vrsqrt.f32 %v1377_v15 }
 0xf53   :  { %v3756_v17 = vpop.eup %3755 }
 0xf54   :  { %v3758_v29 = vpop.eup %3757  ;;  %v1382_v30 = vmul.f32 %v3756_v17, %v1366_v9 }
 0xf55   :  { %v1381_v41 = vmul.f32 %v3758_v29, %v1365_v6 }
 0xf56   :  { %v1388_v39 = vmul.f32 %v2971_v28, %v1382_v30 }
 0xf57   :  { %v1387_v32 = vmul.f32 %v2971_v28, %v1381_v41 }
 0xf58   :  { %v4153_v35 = vadd.f32 %v2972_v31, %v1388_v39 }
 0xf59   :  { %v4151_v33 = vadd.f32 %v2972_v31, %v1387_v32 }
 0xf5b   :  { %3279 = vmatprep.mubr.msk.f32.mxu1 %vm27_vm0, %v4151_v33 }
 0xf5c   :  { %3280 = vmatmul.mubr.msk.f32.vlgmr.msra.gmra.mrb[10].mxu1 %vm27_vm0, %v4153_v35 }
0x102f   :  { %v3281_v38 = vpop.f32.mrb[10].mxu1 }
0x1030   :  { %v4162_v40 = vadd.f32 %v3281_v38, %v2981_v37  ;;  %v1481_v43 = vpop.f32.mrb[11].mxu1 }
0x1031   :  { %v4164_v44 = vadd.f32 %v2981_v37, %v1481_v43 }
0x1033   :  { %3286 = vmatprep.mubr.msk.f32.mxu1 %vm169_vm1, %v4164_v44  ;;  %v4170_v4 = vpack.i.bf16 %v4162_v40, %v4164_v44 }
0x1035   :  { %3647 = vrot.lane.b32.xlu1 %v4170_v4, %s3807_s14  ;;  %3642 = vrot.lane.b32.xlu0 %v4170_v4, %s3808_s15 }
0x1039   :  { %1692 = vrot.lane.b32.xlu1 %v4164_v44, %s3809_s16 }
0x103d   :  { %1694 = vrot.lane.b32.xlu1 %v4162_v40, %s3809_s16 }
0x10a7   :  { %v3648_v45 = vpop.permute.xlu1 %3647  ;;  %v3643_v46 = vpop.permute.xlu0 %3642 }
0x10a8   :  { %v3650_v3 = vunpack.i.h.bf16 %v3648_v45  ;;  %v3649_v47 = vunpack.i.l.bf16 %v3648_v45  ;;  %v3645_v48 = vunpack.i.h.bf16 %v3643_v46  ;;  %v3644_v50 = vunpack.i.l.bf16 %v3643_v46 }
0x10aa   :  { %v3489_v51 = vpack.c.bf16 %v3645_v48, %v3644_v50  ;;  %v3499_v52 = vpack.c.bf16 %v3650_v3, %v3649_v47 }
0x10ab   :  { %v1693_v53 = vpop.permute.xlu1 %1692 }
0x10ac   :  { %3491 = vmatprep.subr.msk.bf16.mxu1 %vm3933_vm2, %v3489_v51 }
0x10ad   :  { %3494 = vmatpush3.bf16.xpose.msk.msra.mxu1 %vm3933_vm2, %v3489_v51 }
0x10ae   :  { %3501 = vmatprep.subr.msk.bf16.mxu1 %vm3933_vm2, %v3499_v52 }
0x10af   :  { %v1695_v54 = vpop.permute.xlu1 %1694 }
0x10b4   :  { %3287 = vmatmul.mubr.msk.f32.vlgmr.msra.gmra.mrb[12].mxu1 %vm169_vm1, %v4162_v40 }
0x10b5   :  { %3504 = vmatpush3.bf16.xpose.msk.msra.mxu1 %vm3933_vm2, %v3499_v52  ;;  %3300 = vmatprep.mubr.msk.f32.mxu1 %vm169_vm1, %v1693_v53 }
0x10bc   :  { %3301 = vmatmul.mubr.msk.f32.vlgmr.msra.gmra.mrb[14].mxu1 %vm169_vm1, %v1695_v54 }
0x1187   :  { %v3288_v56 = vpop.f32.mrb[12].mxu1 }
0x1188   :  { %v1580_v57 = vmul.f32 0.35355338, %v3288_v56  ;;  %v1570_v59 = vpop.f32.mrb[13].mxu1 }
0x1189   :  { %v1579_v60 = vmul.f32 0.35355338, %v1570_v59 }
0x118a   :  { %v1582_v61 = vadd.f32 %v1580_v57, %v3952_v55 }
0x118b   :  { %v1581_v62 = vadd.f32 %v1579_v60, %v3957_v58 }
0x118c   :  { %v1586_v63 = vsel %vm257_vm3, %v1582_v61, -inf }
0x118d   :  { %1587 = vmax.xlane.f32.xlu1 %v1586_v63  ;;  %v1583_v36 = vsel %vm257_vm3, %v1581_v62, -inf }
0x118e   :  { %1584 = vmax.xlane.f32.xlu0 %v1583_v36 }
0x118f   :  { %v3302_v34 = vpop.f32.mrb[14].mxu1 }
0x1190   :  { %v1774_v0 = vpop.f32.mrb[15].mxu1  ;;  %v1784_v1 = vmul.f32 0.35355338, %v3302_v34 }
0x1191   :  { %v1783_v42 = vmul.f32 0.35355338, %v1774_v0 }
0x1192   :  { %v1786_v16 = vadd.f32 %v1784_v1, %v3952_v55 }
0x1193   :  { %v1785_v2 = vadd.f32 %v1783_v42, %v3957_v58 }
0x1194   :  { %v1790_v19 = vsel %vm257_vm3, %v1786_v16, -inf }
0x1195   :  { %v1787_v7 = vsel %vm257_vm3, %v1785_v2, -inf }
0x1196   :  { %1788 = vmax.xlane.f32.xlu0 %v1787_v7 }
0x119a   :  { %1791 = vmax.xlane.f32.xlu0 %v1790_v19 }
0x121a   :  { %v1588_v8 = vpop.xlane.xlu1 %1587 }
0x121b   :  { %v1590_v9 = vsub.f32 %v1582_v61, %v1588_v8  ;;  %v1585_v6 = vpop.xlane.xlu0 %1584  ;;  %v3805_v8 = vld [vmem:[%s4409_s1 + $0x8] sm:$0xff] }
0x121c   :  { %v1589_v5 = vsub.f32 %v1581_v62, %v1585_v6  ;;  %v3806_v6 = vld [vmem:[%s4409_s1] sm:$0xff] }
0x121d   :  { %v1593_v10 = vmul.f32 1.442695, %v1590_v9 }
0x121e   :  { %v1591_v11 = vmul.f32 1.442695, %v1589_v5 }
0x121f   :  { %3759 = vpow2.f32 %v1593_v10 }
0x1220   :  { %3761 = vpow2.f32 %v1591_v11 }
0x1223   :  { %v1789_v12 = vpop.xlane.xlu0 %1788 }
0x1224   :  { %v1793_v20 = vsub.f32 %v1785_v2, %v1789_v12 }
0x1226   :  { %v1795_v23 = vmul.f32 1.442695, %v1793_v20 }
0x1227   :  { %v1792_v58 = vpop.xlane.xlu0 %1791 }
0x1228   :  { %3763 = vpow2.f32 %v1795_v23  ;;  %v1794_v24 = vsub.f32 %v1786_v16, %v1792_v58 }
0x1229   :  { %v3760_v25 = vpop.eup %3759 }
0x122a   :  { %v3762_v55 = vpop.eup %3761  ;;  %v1797_v26 = vmul.f32 1.442695, %v1794_v24  ;;  %v1598_v27 = vsel %vm257_vm3, %v3760_v25, 0.0 }
0x122b   :  { %1599 = vadd.xlane.f32.xlu1 %v1598_v27  ;;  %v1595_v14 = vsel %vm257_vm3, %v3762_v55, 0.0 }
0x122c   :  { %3765 = vpow2.f32 %v1797_v26  ;;  %1596 = vadd.xlane.f32.xlu0 %v1595_v14 }
0x1232   :  { %v3764_v15 = vpop.eup %3763 }
0x1233   :  { %v1799_v17 = vsel %vm257_vm3, %v3764_v15, 0.0 }
0x1234   :  { %1800 = vadd.xlane.f32.xlu0 %v1799_v17 }
0x1236   :  { %v3766_v28 = vpop.eup %3765 }
0x1237   :  { %v1802_v29 = vsel %vm257_vm3, %v3766_v28, 0.0 }
0x1238   :  { %1803 = vadd.xlane.f32.xlu1 %v1802_v29 }
0x1249   :  { %3657 = vrot.lane.b32.xlu1 %v4170_v4, %s3810_s21 }
0x124a   :  { %3652 = vrot.lane.b32.xlu0 %v4170_v4, %s3811_s22 }
0x124d   :  { %3662 = vrot.lane.b32.xlu1 %v4170_v4, %s3812_s23 }
0x124e   :  { %1898 = vrot.lane.b32.xlu0 %v4162_v40, %s3813_s24 }
0x1251   :  { %1896 = vrot.lane.b32.xlu1 %v4164_v44, %s3813_s24 }
0x12b8   :  { %v1600_v41 = vpop.xlane.xlu1 %1599 }
0x12b9   :  { %v1597_v30 = vpop.xlane.xlu0 %1596 }
0x12ba   :  { %3767 = vrcp.f32 %v1597_v30 }
0x12bb   :  { %3769 = vrcp.f32 %v1600_v41 }
0x12c1   :  { %v1801_v31 = vpop.xlane.xlu0 %1800 }
0x12c2   :  { %3771 = vrcp.f32 %v1801_v31 }
0x12c4   :  { %v3768_v39 = vpop.eup %3767 }
0x12c5   :  { %v1804_v32 = vpop.xlane.xlu1 %1803  ;;  %v3653_v37 = vpop.permute.xlu0 %3652  ;;  %v1603_v38 = vmul.f32 %v3768_v39, %v3762_v55 }
0x12c6   :  { %3773 = vrcp.f32 %v1804_v32  ;;  %v3655_v43 = vunpack.i.h.bf16 %v3653_v37  ;;  %v3654_v45 = vunpack.i.l.bf16 %v3653_v37  ;;  %v3770_v3 = vpop.eup %3769 }
0x12c7   :  { %3293 = vmatprep.mubr.msk.f32.mxu0 %vm257_vm3, %v1603_v38  ;;  %v1604_v52 = vmul.f32 %v3770_v3, %v3760_v25 }
0x12c8   :  { %v3495_v46 = vpack.c.bf16 %v3655_v43, %v3654_v45 }
0x12c9   :  { %v3658_v47 = vpop.permute.xlu1 %3657  ;;  %v1899_v36 = vpop.permute.xlu0 %1898 }
0x12ca   :  { %v3660_v48 = vunpack.i.h.bf16 %v3658_v47  ;;  %v3659_v50 = vunpack.i.l.bf16 %v3658_v47  ;;  %3496 = vmatprep.subr.bf16.mxu0 %v3495_v46 }
0x12cb   :  { %3498 = vmatpush3.bf16.msra.mxu0 %v3495_v46 }
0x12cc   :  { %v3772_v51 = vpop.eup %3771  ;;  %v3505_v53 = vpack.c.bf16 %v3660_v48, %v3659_v50 }
0x12cd   :  { %v3663_v54 = vpop.permute.xlu1 %3662  ;;  %v1807_v56 = vmul.f32 %v3772_v51, %v3764_v15 }
0x12ce   :  { %v3665_v57 = vunpack.i.h.bf16 %v3663_v54  ;;  %v3664_v59 = vunpack.i.l.bf16 %v3663_v54  ;;  %3294 = vmatmul.mubr.msk.f32.vlgmr.msra.gmra.mrb[14].mxu0 %vm257_vm3, %v1604_v52  ;;  %3506 = vmatprep.subr.bf16.mxu0 %v3505_v53 }
0x12cf   :  { %3508 = vmatpush3.bf16.msra.mxu0 %v3505_v53  ;;  %3307 = vmatprep.mubr.msk.f32.mxu0 %vm257_vm3, %v1807_v56 }
0x12d0   :  { %v3774_v60 = vpop.eup %3773  ;;  %v3509_v61 = vpack.c.bf16 %v3665_v57, %v3664_v59 }
0x12d1   :  { %v1808_v62 = vmul.f32 %v3774_v60, %v3766_v28  ;;  %v1897_v63 = vpop.permute.xlu1 %1896 }
0x12d2   :  { %3511 = vmatprep.subr.msk.bf16.mxu0 %vm3933_vm2, %v3509_v61 }
0x12d3   :  { %3308 = vmatmul.mubr.msk.f32.vlgmr.msra.gmra.mrb[16].mxu0 %vm257_vm3, %v1808_v62 }
0x12d4   :  { %3314 = vmatprep.mubr.msk.f32.mxu0 %vm169_vm1, %v1897_v63 }
0x12d8   :  { %3514 = vmatpush3.bf16.xpose.msk.msra.mxu0 %vm3933_vm2, %v3509_v61 }
0x12df   :  { %3315 = vmatmul.mubr.msk.f32.vlgmr.msra.gmra.mrb[18].mxu0 %vm169_vm1, %v1899_v36 }
0x13a1   :  { %v4224_v34 = vpop.f32.mrb[14].mxu0 }
0x13a2   :  { %v4226_v0 = vpop.f32.mrb[15].mxu0 }
0x13a6   :  { %v4228_v1 = vpop.f32.mrb[16].mxu0 }
0x13a7   :  { %v4230_v42 = vpop.f32.mrb[17].mxu0 }
0x13b2   :  { %v3316_v2 = vpop.f32.mrb[18].mxu0 }
0x13b3   :  { %v1988_v7 = vmul.f32 0.35355338, %v3316_v2  ;;  %v1978_v16 = vpop.f32.mrb[19].mxu0 }
0x13b4   :  { %v1987_v19 = vmul.f32 0.35355338, %v1978_v16 }
0x13b5   :  { %v1990_v9 = vadd.f32 %v3805_v8, %v1988_v7 }
0x13b6   :  { %v1989_v5 = vadd.f32 %v3806_v6, %v1987_v19  ;;  %v3681_v19 = vpack.i.bf16 %v4129_v18, %v4124_v13 }
0x13b7   :  { %v1994_v10 = vsel %vm257_vm3, %v1990_v9, -inf }
0x13b8   :  { %1995 = vmax.xlane.f32.xlu0 %v1994_v10  ;;  %v1991_v11 = vsel %vm257_vm3, %v1989_v5, -inf }
0x13b9   :  { %1992 = vmax.xlane.f32.xlu1 %v1991_v11 }
0x13ca   :  { %3667 = vrot.lane.b32.xlu1 %v4170_v4, %s3814_s0 }
0x13ce   :  { %2100 = vrot.lane.b32.xlu1 %v4164_v44, %s3815_s25 }
0x13d2   :  { %2102 = vrot.lane.b32.xlu1 %v4162_v40, %s3815_s25 }
0x1445   :  { %v1996_v12 = vpop.xlane.xlu0 %1995 }
0x1446   :  { %v1998_v20 = vsub.f32 %v1990_v9, %v1996_v12  ;;  %v1993_v23 = vpop.xlane.xlu1 %1992 }
0x1447   :  { %v1997_v58 = vsub.f32 %v1989_v5, %v1993_v23 }
0x1448   :  { %v2001_v24 = vmul.f32 1.442695, %v1998_v20 }
0x1449   :  { %v1999_v25 = vmul.f32 1.442695, %v1997_v58 }
0x144a   :  { %3775 = vpow2.f32 %v2001_v24  ;;  %v3668_v55 = vpop.permute.xlu1 %3667 }
0x144b   :  { %v3670_v26 = vunpack.i.h.bf16 %v3668_v55  ;;  %v3669_v27 = vunpack.i.l.bf16 %v3668_v55  ;;  %3777 = vpow2.f32 %v1999_v25 }
0x144d   :  { %v3515_v14 = vpack.c.bf16 %v3670_v26, %v3669_v27 }
0x144e   :  { %v2101_v45 = vpop.permute.xlu1 %2100 }
0x144f   :  { %3516 = vmatprep.subr.bf16.mxu1 %v3515_v14 }
0x1450   :  { %3518 = vmatpush3.bf16.msra.mxu1 %v3515_v14 }
0x1452   :  { %v2103_v46 = vpop.permute.xlu1 %2102 }
0x1454   :  { %v3776_v15 = vpop.eup %3775 }
0x1455   :  { %v2006_v44 = vsel %vm257_vm3, %v3776_v15, 0.0  ;;  %v3778_v17 = vpop.eup %3777 }
0x1456   :  { %2007 = vadd.xlane.f32.xlu0 %v2006_v44  ;;  %v2003_v40 = vsel %vm257_vm3, %v3778_v17, 0.0 }
0x145a   :  { %2004 = vadd.xlane.f32.xlu0 %v2003_v40 }
0x1470   :  { %3672 = vrot.lane.b32.xlu0 %v4170_v4, %s3816_s26 }
0x14e3   :  { %v2008_v28 = vpop.xlane.xlu0 %2007 }
0x14e4   :  { %3779 = vrcp.f32 %v2008_v28 }
0x14e7   :  { %v2005_v29 = vpop.xlane.xlu0 %2004 }
0x14e8   :  { %3781 = vrcp.f32 %v2005_v29 }
0x14eb   :  { %v3673_v30 = vpop.permute.xlu0 %3672 }
0x14ec   :  { %v3675_v41 = vunpack.i.h.bf16 %v3673_v30  ;;  %v3674_v31 = vunpack.i.l.bf16 %v3673_v30 }
0x14ee   :  { %v3519_v39 = vpack.c.bf16 %v3675_v41, %v3674_v31  ;;  %v3780_v32 = vpop.eup %3779 }
0x14ef   :  { %v2012_v43 = vmul.f32 %v3780_v32, %v3776_v15 }
0x14f0   :  { %3521 = vmatprep.subr.msk.bf16.mxu1 %vm3933_vm2, %v3519_v39 }
0x14f2   :  { %v3782_v37 = vpop.eup %3781 }
0x14f3   :  { %v2011_v38 = vmul.f32 %v3782_v37, %v3778_v17 }
0x14f5   :  { %3321 = vmatprep.mubr.msk.f32.mxu1 %vm257_vm3, %v2011_v38 }
0x14f6   :  { %3322 = vmatmul.mubr.msk.f32.vlgmr.msra.gmra.mrb[16].mxu1 %vm257_vm3, %v2012_v43 }
0x14f7   :  { %3524 = vmatpush3.bf16.xpose.msk.msra.mxu1 %vm3933_vm2, %v3519_v39  ;;  %3328 = vmatprep.mubr.msk.f32.mxu1 %vm169_vm1, %v2101_v45 }
0x14fe   :  { %3329 = vmatmul.mubr.msk.f32.vlgmr.msra.gmra.mrb[18].mxu1 %vm169_vm1, %v2103_v46 }
0x15c9   :  { %v3323_v3 = vpop.f32.mrb[16].mxu1 }
0x15ca   :  { %v2091_v47 = vpop.f32.mrb[17].mxu1 }
0x15d1   :  { %v3330_v48 = vpop.f32.mrb[18].mxu1 }
0x15d2   :  { %v2192_v50 = vmul.f32 0.35355338, %v3330_v48  ;;  %v2182_v51 = vpop.f32.mrb[19].mxu1 }
0x15d3   :  { %v2191_v52 = vmul.f32 0.35355338, %v2182_v51 }
0x15d4   :  { %v2194_v53 = vadd.f32 %v3805_v8, %v2192_v50 }
0x15d5   :  { %v2193_v54 = vadd.f32 %v3806_v6, %v2191_v52 }
0x15d6   :  { %v2198_v56 = vsel %vm257_vm3, %v2194_v53, -inf }
0x15d7   :  { %2199 = vmax.xlane.f32.xlu0 %v2198_v56  ;;  %v2195_v57 = vsel %vm257_vm3, %v2193_v54, -inf }
0x15d8   :  { %2196 = vmax.xlane.f32.xlu1 %v2195_v57 }
0x15e9   :  { %3677 = vrot.lane.b32.xlu1 %v4170_v4, %s3817_s27 }
0x15ed   :  { %3687 = vrot.lane.b32.xlu1 %v3686_v49, %s3818_s28  ;;  %v2976_v49 = vld [vmem:[%s4407_s3 + $0x58] sm:$0xff] }
0x15f1   :  { %2306 = vrot.lane.b32.xlu1 %v4230_v42, %s3819_s29 }
0x15f5   :  { %2308 = vrot.lane.b32.xlu1 %v4228_v1, %s3819_s29 }
0x15f9   :  { %2316 = vrot.lane.b32.xlu1 %v3323_v3, %s3820_s30 }
0x1664   :  { %v2200_v59 = vpop.xlane.xlu0 %2199 }
0x1665   :  { %v2202_v60 = vsub.f32 %v2194_v53, %v2200_v59  ;;  %v2197_v61 = vpop.xlane.xlu1 %2196 }
0x1666   :  { %v2201_v62 = vsub.f32 %v2193_v54, %v2197_v61  ;;  %v2980_v61 = vld [vmem:[%s4407_s3 + $0x78] sm:$0xff] }
0x1667   :  { %v2205_v63 = vmul.f32 1.442695, %v2202_v60  ;;  %v2978_v60 = vld [vmem:[%s4407_s3 + $0x68] sm:$0xff] }
0x1668   :  { %v2203_v36 = vmul.f32 1.442695, %v2201_v62  ;;  %v3541_v62 = vpack.c.bf16 %v2980_v61, %v2978_v60 }
0x1669   :  { %v3678_v4 = vpop.permute.xlu1 %3677 }
0x166a   :  { %3783 = vpow2.f32 %v2203_v36  ;;  %v3680_v2 = vunpack.i.h.bf16 %v3678_v4  ;;  %v3679_v21 = vunpack.i.l.bf16 %v3678_v4 }
0x166b   :  { %3785 = vpow2.f32 %v2205_v63 }
0x166c   :  { %v3525_v22 = vpack.c.bf16 %v3680_v2, %v3679_v21 }
0x166d   :  { %v3688_v12 = vpop.permute.xlu1 %3687 }
0x166e   :  { %3526 = vmatprep.subr.bf16.mxu0 %v3525_v22  ;;  %v3690_v23 = vunpack.i.h.bf16 %v3688_v12  ;;  %v3689_v58 = vunpack.i.l.bf16 %v3688_v12  ;;  %v3017_v12 = vld [vmem:[%s4410_s4 + $0x48] sm:$0xff] }
0x166f   :  { %3528 = vmatpush3.bf16.msra.mxu0 %v3525_v22 }
0x1670   :  { %v3533_v18 = vpack.c.bf16 %v3690_v23, %v3689_v58  ;;  %v3018_v23 = vld [vmem:[%s4410_s4 + $0x50] sm:$0xff]  ;;  %v3019_v58 = vld [vmem:[%s4410_s4 + $0x58] sm:$0xff] }
0x1671   :  { %v2307_v27 = vpop.permute.xlu1 %2306 }
0x1672   :  { %v2328_v17 = vsel %vm169_vm1, %v4226_v0, %v2307_v27  ;;  %v3008_v0 = vld [vmem:[%s4408_s2 + $0xd] ss:$0 sm:$0xff] }
0x1674   :  { %v3784_v42 = vpop.eup %3783 }
0x1675   :  { %v2207_v7 = vsel %vm257_vm3, %v3784_v42, 0.0  ;;  %v3786_v1 = vpop.eup %3785  ;;  %v2309_v14 = vpop.permute.xlu1 %2308 }
0x1676   :  { %2208 = vadd.xlane.f32.xlu0 %v2207_v7  ;;  %v2210_v16 = vsel %vm257_vm3, %v3786_v1, 0.0  ;;  %v2329_v28 = vsel %vm169_vm1, %v4224_v34, %v2309_v14  ;;  %v3011_v7 = vld [vmem:[%s4408_s2 + $0xe] ss:$0 sm:$0xff]  ;;  %v3013_v14 = vld [vmem:[%s4408_s2 + $0x10] ss:$0 sm:$0xff] }
0x1679   :  { %v2317_v15 = vpop.permute.xlu1 %2316 }
0x167a   :  { %2211 = vadd.xlane.f32.xlu0 %v2210_v16  ;;  %v2331_v41 = vsel %vm257_vm3, %v2329_v28, %v2317_v15  ;;  %v3012_v16 = vld [vmem:[%s4408_s2 + $0xf] ss:$0 sm:$0xff] }
0x1690   :  { %3682 = vrot.lane.b32.xlu0 %v3681_v19, %s3818_s28 }
0x1694   :  { %2314 = vrot.lane.b32.xlu0 %v2091_v47, %s3820_s30 }
0x1703   :  { %v2209_v8 = vpop.xlane.xlu0 %2208 }
0x1704   :  { %3787 = vrcp.f32 %v2209_v8 }
0x1707   :  { %v2212_v9 = vpop.xlane.xlu0 %2211 }
0x1708   :  { %3789 = vrcp.f32 %v2212_v9 }
0x170b   :  { %v3683_v6 = vpop.permute.xlu0 %3682 }
0x170c   :  { %v3685_v5 = vunpack.i.h.bf16 %v3683_v6  ;;  %v3684_v10 = vunpack.i.l.bf16 %v3683_v6 }
0x170e   :  { %v3788_v11 = vpop.eup %3787  ;;  %v3529_v20 = vpack.c.bf16 %v3685_v5, %v3684_v10 }
0x170f   :  { %v2215_v24 = vmul.f32 %v3788_v11, %v3784_v42  ;;  %v2315_v44 = vpop.permute.xlu0 %2314  ;;  %v3016_v11 = vld [vmem:[%s4410_s4 + $0x40] sm:$0xff] }
0x1710   :  { %3530 = vmatprep.subr.bf16.mxu0 %v3529_v20  ;;  %v2330_v29 = vsel %vm257_vm3, %v2328_v17, %v2315_v44 }
0x1711   :  { %3335 = vmatprep.mubr.msk.f32.mxu0 %vm257_vm3, %v2215_v24  ;;  %v3020_v24 = vld [vmem:[%s4410_s4 + $0x60] sm:$0xff] }
0x1712   :  { %v3790_v13 = vpop.eup %3789 }
0x1713   :  { %v2216_v25 = vmul.f32 %v3790_v13, %v3786_v1  ;;  %v3549_v13 = vpack.c.bf16 %v3019_v58, %v3018_v23  ;;  %v2814_v58 = vld [vmem:[%s4411_s5 + $0x38] sm:$0xff] }
0x1715   :  { %3336 = vmatmul.mubr.msk.f32.vlgmr.msra.gmra.mrb[20].mxu0 %vm257_vm3, %v2216_v25 }
0x1716   :  { %3532 = vmatpush3.bf16.msra.mxu0 %v3529_v20  ;;  %v3545_v20 = vpack.c.bf16 %v3017_v12, %v3016_v11  ;;  %v2812_v11 = vld [vmem:[%s4411_s5 + $0x28] sm:$0xff] }
0x1717   :  { %3534 = vmatprep.subr.bf16.mxu0 %v3533_v18 }
0x171a   :  { %3536 = vmatpush3.bf16.msra.mxu0 %v3533_v18  ;;  %v3021_v18 = vld [vmem:[%s4410_s4 + $0x68] sm:$0xff] }
0x171b   :  { %3546 = vmatprep.subr.bf16.mxu0 %v3545_v20  ;;  %v3553_v25 = vpack.c.bf16 %v3021_v18, %v3020_v24 }
0x17e8   :  { %v3337_v55 = vpop.f32.mrb[20].mxu0 }
0x17e9   :  { %2324 = vrot.lane.b32.xlu1 %v3337_v55, %s3821_s7  ;;  %v2295_v26 = vpop.f32.mrb[21].mxu0  ;;  %v3022_v55 = vld [vmem:[%s4410_s4 + $0x70] sm:$0xff] }
0x17ea   :  { %2322 = vrot.lane.b32.xlu0 %v2295_v26, %s3821_s7  ;;  %v3023_v26 = vld [vmem:[%s4410_s4 + $0x78] sm:$0xff] }
0x17eb   :  { %v3557_v27 = vpack.c.bf16 %v3023_v26, %v3022_v55 }
0x185b   :  { %v2325_v40 = vpop.permute.xlu1 %2324 }
0x185c   :  { %v2323_v30 = vpop.permute.xlu0 %2322  ;;  %v2333_v39 = vsel %vm1007_vm4, %v2331_v41, %v2325_v40 }
0x185d   :  { %v2332_v31 = vsel %vm1007_vm4, %v2330_v29, %v2323_v30 }
0x185e   :  { %3346 = vmatprep.mubr.msk.f32.mxu0 %vm27_vm0, %v2332_v31 }
0x185f   :  { %3347 = vmatmul.mubr.msk.f32.vlgmr.msra.gmra.mrb[22].mxu0 %vm27_vm0, %v2333_v39 }
0x1860   :  { %3548 = vmatpush3.bf16.msra.mxu0 %v3545_v20 }
0x1861   :  { %3550 = vmatprep.subr.bf16.mxu0 %v3549_v13 }
0x1864   :  { %3552 = vmatpush3.bf16.msra.mxu0 %v3549_v13 }
0x1865   :  { %3554 = vmatprep.subr.bf16.mxu0 %v3553_v25 }
0x1868   :  { %3556 = vmatpush3.bf16.msra.mxu0 %v3553_v25 }
0x1869   :  { %3558 = vmatprep.subr.bf16.mxu0 %v3557_v27 }
0x186c   :  { %3560 = vmatpush3.bf16.msra.mxu0 %v3557_v27 }
0x1932   :  { %v3348_v32 = vpop.f32.mrb[22].mxu0 }
0x1933   :  { %v2433_v37 = vadd.f32 %v3348_v32, %v3008_v0  ;;  %v2427_v34 = vpop.f32.mrb[23].mxu0 }
0x1934   :  { %v2428_v38 = vadd.f32 %v3008_v0, %v2427_v34 }
0x1935   :  { %v2437_v43 = vadd.f32 %v2433_v37, %v4153_v35 }
0x1936   :  { %v2436_v45 = vadd.f32 %v2428_v38, %v4151_v33  ;;  %v2974_v33 = vld [vmem:[%s4407_s3 + $0x48] sm:$0xff] }
0x1937   :  { %v2443_v46 = vsel %vm27_vm0, %v2437_v43, 0.0  ;;  %v3537_v59 = vpack.c.bf16 %v2976_v49, %v2974_v33 }
0x1938   :  { %2444 = vadd.xlane.f32.xlu1 %v2443_v46  ;;  %v2440_v3 = vsel %vm27_vm0, %v2436_v45, 0.0 }
0x1939   :  { %2441 = vadd.xlane.f32.xlu0 %v2440_v3  ;;  %3538 = vmatprep.subr.bf16.mxu1 %v3537_v59 }
0x193a   :  { %3540 = vmatpush3.bf16.msra.mxu1 %v3537_v59 }
0x193b   :  { %3542 = vmatprep.subr.bf16.mxu1 %v3541_v62 }
0x193e   :  { %3544 = vmatpush3.bf16.msra.mxu1 %v3541_v62 }
0x19c5   :  { %v2445_v47 = vpop.xlane.xlu1 %2444 }
0x19c6   :  { %v2447_v48 = vmul.f32 0.03125, %v2445_v47  ;;  %v2442_v50 = vpop.xlane.xlu0 %2441 }
0x19c7   :  { %v2446_v51 = vmul.f32 0.03125, %v2442_v50 }
0x19c8   :  { %v2449_v52 = vsub.f32 %v2437_v43, %v2447_v48 }
0x19c9   :  { %v2448_v53 = vsub.f32 %v2436_v45, %v2446_v51  ;;  %v3024_v51 = vld [vmem:[%s4408_s2 + $0x11] ss:$0 sm:$0xff] }
0x19ca   :  { %v2451_v57 = vmul.f32 %v2449_v52, %v2449_v52 }
0x19cb   :  { %v2450_v54 = vmul.f32 %v2448_v53, %v2448_v53 }
0x19cc   :  { %v2455_v35 = vsel %vm27_vm0, %v2451_v57, 0.0 }
0x19cd   :  { %v2452_v56 = vsel %vm27_vm0, %v2450_v54, 0.0 }
0x19ce   :  { %2453 = vadd.xlane.f32.xlu0 %v2452_v56 }
0x19d2   :  { %2456 = vadd.xlane.f32.xlu0 %v2455_v35 }
0x1a5b   :  { %v2454_v63 = vpop.xlane.xlu0 %2453 }
0x1a5c   :  { %v2458_v36 = vmul.f32 0.03125, %v2454_v63 }
0x1a5e   :  { %v2460_v4 = vadd.f32 1e-12, %v2458_v36 }
0x1a5f   :  { %v2457_v2 = vpop.xlane.xlu0 %2456 }
0x1a60   :  { %3791 = vrsqrt.f32 %v2460_v4  ;;  %v2459_v21 = vmul.f32 0.03125, %v2457_v2 }
0x1a62   :  { %v2461_v22 = vadd.f32 1e-12, %v2459_v21 }
0x1a64   :  { %3793 = vrsqrt.f32 %v2461_v22 }
0x1a6a   :  { %v3792_v42 = vpop.eup %3791 }
0x1a6b   :  { %v2464_v1 = vmul.f32 %v3792_v42, %v2448_v53  ;;  %v2724_v42 = vld [vmem:[%s4411_s5] sm:$0xff] }
0x1a6d   :  { %v2470_v19 = vmul.f32 %v3011_v7, %v2464_v1 }
0x1a6e   :  { %v3794_v8 = vpop.eup %3793 }
0x1a6f   :  { %v2465_v9 = vmul.f32 %v3794_v8, %v2449_v52  ;;  %v2476_v6 = vadd.f32 %v3012_v16, %v2470_v19  ;;  %v2726_v19 = vld [vmem:[%s4411_s5 + $0x20] sm:$0xff]  ;;  %v2727_v8 = vld [vmem:[%s4411_s5 + $0x30] sm:$0xff] }
0x1a70   :  { %v3701_v23 = vpack.i.bf16 %v2812_v11, %v2726_v19  ;;  %v3706_v24 = vpack.i.bf16 %v2814_v58, %v2727_v8 }
0x1a71   :  { %v2471_v5 = vmul.f32 %v3011_v7, %v2465_v9  ;;  %3357 = vmatprep.mubr.msk.f32.mxu1 %vm27_vm0, %v2476_v6  ;;  %v2725_v7 = vld [vmem:[%s4411_s5 + $0x10] sm:$0xff]  ;;  %v3565_v9 = vpack.c.bf16 %v2727_v8, %v2726_v19 }
0x1a72   :  { %v3562_v1 = vpack.c.bf16 %v2725_v7, %v2724_v42 }
0x1a73   :  { %v2477_v10 = vadd.f32 %v3012_v16, %v2471_v5  ;;  %v3822_v16 = vmov 0.0|0.0   ;;  %v2810_v5 = vld [vmem:[%s4411_s5 + $0x18] sm:$0xff] }
0x1a74   :  { %3561 = vmatprep.subr.bf16.mxu1 %v3822_v16  ;;  %v3696_v12 = vpack.i.bf16 %v2810_v5, %v2725_v7 }
0x1a75   :  { %3358 = vmatmul.mubr.msk.f32.vlgmr.msra.gmra.mrb[20].mxu1 %vm27_vm0, %v2477_v10 }
0x1a76   :  { %3563 = vmatpush3.bf16.msra.mxu1 %v3562_v1 }
0x1a77   :  { %3564 = vmatprep.subr.bf16.mxu1 %v3822_v16 }
0x1a7a   :  { %3566 = vmatpush3.bf16.msra.mxu1 %v3565_v9 }
0x1a7b   :  { %3567 = vmatprep.subr.bf16.mxu1 %v3822_v16 }
0x1b48   :  { %v3359_v15 = vpop.f32.mrb[20].mxu1 }
0x1b49   :  { %v2561_v44 = vadd.f32 %v3359_v15, %v3013_v14  ;;  %v2555_v17 = vpop.f32.mrb[21].mxu1 }
0x1b4a   :  { %v2556_v40 = vadd.f32 %v3013_v14, %v2555_v17  ;;  %v3027_v17 = vld [vmem:[%s4408_s2 + $0x12] ss:$0 sm:$0xff] }
0x1b4b   :  { %v2567_v28 = vmul.f32 0.044715, %v2561_v44  ;;  %v2565_v47 = vmul.f32 0.5, %v2561_v44 }
0x1b4c   :  { %v2566_v29 = vmul.f32 0.044715, %v2556_v40  ;;  %v2564_v46 = vmul.f32 0.5, %v2556_v40 }
0x1b4d   :  { %v2569_v30 = vmul.f32 %v2567_v28, %v2561_v44 }
0x1b4e   :  { %v2568_v41 = vmul.f32 %v2566_v29, %v2556_v40 }
0x1b4f   :  { %v2571_v31 = vmul.f32 %v2569_v30, %v2561_v44 }
0x1b50   :  { %v2570_v39 = vmul.f32 %v2568_v41, %v2556_v40 }
0x1b51   :  { %v2573_v0 = vadd.f32 %v2571_v31, %v2561_v44 }
0x1b52   :  { %v2572_v32 = vadd.f32 %v2570_v39, %v2556_v40 }
0x1b53   :  { %v2575_v37 = vmul.f32 0.7978846, %v2573_v0  ;;  %v3028_v0 = vld [vmem:[%s4408_s2 + $0x13] ss:$0 sm:$0xff] }
0x1b54   :  { %v2574_v34 = vmul.f32 0.7978846, %v2572_v32 }
0x1b55   :  { %3795 = vtanh.f32 %v2575_v37 }
0x1b56   :  { %3797 = vtanh.f32 %v2574_v34 }
0x1b5f   :  { %v3796_v38 = vpop.eup %3795 }
0x1b60   :  { %v3798_v43 = vpop.eup %3797  ;;  %v2579_v45 = vadd.f32 1.0, %v3796_v38 }
0x1b61   :  { %v2578_v3 = vadd.f32 1.0, %v3798_v43 }
0x1b62   :  { %v2581_v50 = vmul.f32 %v2579_v45, %v2565_v47 }
0x1b63   :  { %v2580_v48 = vmul.f32 %v2578_v3, %v2564_v46 }
0x1b65   :  { %3376 = vmatprep.mubr.msk.f32.mxu0 %vm1271_vm5, %v2580_v48 }
0x1b66   :  { %3377 = vmatmul.mubr.msk.f32.vlgmr.msra.gmra.mrb[24].mxu0 %vm1271_vm5, %v2581_v50 }
0x1c39   :  { %v3378_v52 = vpop.f32.mrb[24].mxu0 }
0x1c3a   :  { %v2674_v53 = vadd.f32 %v3378_v52, %v3024_v51  ;;  %v2668_v54 = vpop.f32.mrb[25].mxu0 }
0x1c3b   :  { %v2669_v56 = vadd.f32 %v3024_v51, %v2668_v54 }
0x1c3c   :  { %v2678_v57 = vadd.f32 %v2674_v53, %v2477_v10  ;;  %v2808_v10 = vld [vmem:[%s4411_s5 + $0x8] sm:$0xff] }
0x1c3d   :  { %v2677_v35 = vadd.f32 %v2669_v56, %v2476_v6  ;;  %v3824_v6 = vmov 0.0   ;;  %v3691_v20 = vpack.i.bf16 %v2808_v10, %v2724_v42 }
0x1c3e   :  { %v2684_v33 = vsel %vm27_vm0, %v2678_v57, 0.0  ;;  %3387 = vmatprep.mubr.msk.f32.mxu1 %vm3823_vm6, %v3824_v6 }
0x1c3f   :  { %2685 = vadd.xlane.f32.xlu0 %v2684_v33  ;;  %v2681_v49 = vsel %vm27_vm0, %v2677_v35, 0.0  ;;  %v3029_v33 = vld [vmem:[%s4408_s2 + $0x2] ss:$0 sm:$0xff] }
0x1c40   :  { %2682 = vadd.xlane.f32.xlu1 %v2681_v49 }
0x1ccc   :  { %v2686_v59 = vpop.xlane.xlu0 %2685 }
0x1ccd   :  { %v2688_v60 = vmul.f32 0.03125, %v2686_v59  ;;  %v2683_v61 = vpop.xlane.xlu1 %2682 }
0x1cce   :  { %v2687_v62 = vmul.f32 0.03125, %v2683_v61 }
0x1ccf   :  { %v2690_v63 = vsub.f32 %v2678_v57, %v2688_v60 }
0x1cd0   :  { %v2689_v36 = vsub.f32 %v2677_v35, %v2687_v62  ;;  %v3031_v62 = vld [vmem:[%s4408_s2 + $0x3] ss:$0 sm:$0xff] }
0x1cd1   :  { %v2692_v4 = vmul.f32 %v2690_v63, %v2690_v63 }
0x1cd2   :  { %v2691_v2 = vmul.f32 %v2689_v36, %v2689_v36 }
0x1cd3   :  { %v2696_v21 = vsel %vm27_vm0, %v2692_v4, 0.0 }
0x1cd4   :  { %2697 = vadd.xlane.f32.xlu0 %v2696_v21  ;;  %v2693_v22 = vsel %vm27_vm0, %v2691_v2, 0.0 }
0x1cd5   :  { %2694 = vadd.xlane.f32.xlu1 %v2693_v22 }
0x1ce6   :  { %3697 = vrot.lane.b32.xlu1 %v3696_v12, %s3807_s14 }
0x1cea   :  { %3692 = vrot.lane.b32.xlu0 %v3691_v20, %s3807_s14  ;;  %3702 = vrot.lane.b32.xlu1 %v3701_v23, %s3807_s14 }
0x1cee   :  { %3707 = vrot.lane.b32.xlu1 %v3706_v24, %s3807_s14 }
0x1d61   :  { %v2698_v13 = vpop.xlane.xlu0 %2697 }
0x1d62   :  { %v2700_v18 = vmul.f32 0.03125, %v2698_v13  ;;  %v2695_v25 = vpop.xlane.xlu1 %2694 }
0x1d63   :  { %v2699_v55 = vmul.f32 0.03125, %v2695_v25 }
0x1d64   :  { %v2702_v26 = vadd.f32 1e-12, %v2700_v18 }
0x1d65   :  { %v2701_v27 = vadd.f32 1e-12, %v2699_v55  ;;  %v3693_v15 = vpop.permute.xlu0 %3692 }
0x1d66   :  { %3799 = vrsqrt.f32 %v2702_v26  ;;  %v3698_v14 = vpop.permute.xlu1 %3697  ;;  %v3695_v29 = vunpack.i.h.bf16 %v3693_v15  ;;  %v3694_v30 = vunpack.i.l.bf16 %v3693_v15 }
0x1d67   :  { %3801 = vrsqrt.f32 %v2701_v27  ;;  %v3700_v40 = vunpack.i.h.bf16 %v3698_v14  ;;  %v3699_v28 = vunpack.i.l.bf16 %v3698_v14 }
0x1d68   :  { %v2845_v38 = vsel %vm2844_vm7, %v3694_v30, %v3695_v29 }
0x1d69   :  { %v2846_v34 = vsel %vm2844_vm7, %v3699_v28, %v3700_v40 }
0x1d6a   :  { %v3568_v3 = vpack.c.bf16 %v2846_v34, %v2845_v38  ;;  %v3703_v48 = vpop.permute.xlu1 %3702 }
0x1d6b   :  { %v3705_v50 = vunpack.i.h.bf16 %v3703_v48  ;;  %v3704_v51 = vunpack.i.l.bf16 %v3703_v48 }
0x1d6d   :  { %v2847_v53 = vsel %vm2844_vm7, %v3704_v51, %v3705_v50 }
0x1d6e   :  { %v3708_v52 = vpop.permute.xlu1 %3707 }
0x1d6f   :  { %v3710_v54 = vunpack.i.h.bf16 %v3708_v52  ;;  %v3709_v56 = vunpack.i.l.bf16 %v3708_v52 }
0x1d70   :  { %v3800_v44 = vpop.eup %3799 }
0x1d71   :  { %v3802_v41 = vpop.eup %3801  ;;  %v2706_v31 = vmul.f32 %v3800_v44, %v2690_v63  ;;  %v2848_v57 = vsel %vm2844_vm7, %v3709_v56, %v3710_v54 }
0x1d72   :  { %v2705_v39 = vmul.f32 %v3802_v41, %v2689_v36  ;;  %v3571_v35 = vpack.c.bf16 %v2848_v57, %v2847_v53 }
0x1d73   :  { %v2712_v32 = vmul.f32 %v3027_v17, %v2706_v31 }
0x1d74   :  { %v2711_v37 = vmul.f32 %v3027_v17, %v2705_v39 }
0x1d75   :  { %v2718_v43 = vadd.f32 %v3028_v0, %v2712_v32 }
0x1d76   :  { %v2717_v45 = vadd.f32 %v3028_v0, %v2711_v37 }
0x1d77   :  { %v2720_v46 = vrot.slane %v2718_v43, 7 }
0x1d79   :  { %v2723_v47 = vsel %vm2722_vm8, %v2717_v45, %v2720_v46 }
0x1d7a   :  { %3388 = vmatmul.mubr.msk.f32.vlgmr.msra.gmra.mrb[22].mxu1 %vm27_vm0, %v2723_v47 }
0x1d7b   :  { %3569 = vmatpush3.bf16.msra.mxu1 %v3568_v3  ;;  %3398 = vmatprep.mubr.msk.f32.mxu1 %vm3823_vm6, %v3824_v6 }
0x1d7c   :  { %3570 = vmatprep.subr.bf16.mxu1 %v3822_v16 }
0x1d7f   :  { %3572 = vmatpush3.bf16.msra.mxu1 %v3571_v35 }
0x1e4d   :  { %v2802_v49 = vpop.f32.mrb[22].mxu1 }
0x1e4e   :  { %v2803_v59 = vadd.f32 %v3029_v33, %v2802_v49  ;;  %v3389_v60 = vpop.f32.mrb[23].mxu1 }
0x1e50   :  { %3803 = vtanh.f32 %v2803_v59 }
0x1e5a   :  { %v3804_v61 = vpop.eup %3803 }
0x1e5b   :  { %3399 = vmatmul.mubr.msk.f32.vlgmr.msra.gmra.mrb[24].mxu1 %vm27_vm0, %v3804_v61 }
0x1f2e   :  { %v2922_v63 = vpop.f32.mrb[24].mxu1 }
0x1f2f   :  { %v2923_v36 = vadd.f32 %v3031_v62, %v2922_v63  ;;  %v3400_v4 = vpop.f32.mrb[25].mxu1 }
0x1f31   :  { %2926 = vst [vmem:[%s4412_s6] sm:$0x3] %v2923_v36 }

</bundles_post_ra>
